<compile_context>
chip_gen: v7x
topology: tpu7x:2x2x1
jax: 0.10.0
libtpu: 0.0.40
codegen_flags: <defaults>
</compile_context>

<pallas_src>
import functools

import jax
import jax.numpy as jnp
from jax.experimental import pallas as pl
from jax.experimental.pallas import tpu as pltpu

EPS = 1e-5
_MIB = 1024 * 1024


# --------------------------------------------------------------------------
# In-kernel GroupNorm folding helper (fused path)
# --------------------------------------------------------------------------
def _gn_fold(v, gamma, beta, *, num_groups, count, pad_corr=None):
    """Fold GroupNorm of v (C, Sp) into per-channel scale/shift of shape (C,1).

    `count` = number of VALID elements per group (true spatial * C/G).
    `pad_corr` (optional): per-group (pad_sum, pad_sumsq) (1,1) arrays to
    subtract so zero-padded spatial positions do not perturb the statistics.
    All math in f32.
    """
    c = v.shape[0]
    cpg = c // num_groups
    row = jax.lax.broadcasted_iota(jnp.int32, (c, 1), 0)
    scale = jnp.zeros((c, 1), jnp.float32)
    shift = jnp.zeros((c, 1), jnp.float32)
    for grp in range(num_groups):
        blk = v[grp * cpg:(grp + 1) * cpg, :]                       # (cpg, Sp)
        s_ = jnp.sum(jnp.sum(blk, axis=1, keepdims=True),
                     axis=0, keepdims=True)                         # (1, 1)
        q_ = jnp.sum(jnp.sum(blk * blk, axis=1, keepdims=True),
                     axis=0, keepdims=True)
        if pad_corr is not None:
            s_ = s_ - pad_corr[grp][0]
            q_ = q_ - pad_corr[grp][1]
        mean = s_ / count
        var = jnp.maximum(q_ / count - mean * mean, 0.0)
        inv = jax.lax.rsqrt(var + EPS)
        sel = (row >= grp * cpg) & (row < (grp + 1) * cpg)
        scale = jnp.where(sel, inv * gamma, scale)
        shift = jnp.where(sel, beta - mean * inv * gamma, shift)
    return scale, shift


# --------------------------------------------------------------------------
# Fused single-call kernel (whole sample resident in VMEM)
# --------------------------------------------------------------------------
def _fused_kernel(x_ref, g_ref, wx_ref, wg_ref, w1_ref, w2_ref, b2_ref,
                  gamma_ref, beta_ref, o_ref, *, num_groups, valid_spatial,
                  pad_count):
    co = o_ref.shape[1]
    cpg = co // num_groups
    count = float(valid_spatial * cpg)

    x = x_ref[0].astype(jnp.float32)                                # (Cx, Sp)
    g = g_ref[0].astype(jnp.float32)                                # (Cg, Sp)
    gamma = gamma_ref[...]                                          # (Co, 1)
    beta = beta_ref[...]
    b2 = b2_ref[...]

    # gw = Wg(g); its GroupNorm folded to per-channel scale/shift (pad region
    # of g is zero -> gw is zero there -> no stat correction needed).
    gw = jnp.dot(wg_ref[...], g, preferred_element_type=jnp.float32)
    sg, hg = _gn_fold(gw, gamma, beta, num_groups=num_groups, count=count)
    g1 = gw * sg + hg

    x1 = jnp.dot(wx_ref[...], x, preferred_element_type=jnp.float32)
    act = jnp.maximum(x1 + g1, 0.0)
    # conv_1 (Co -> 1): VPU multiply + sublane reduce, sigmoid on EUP.
    att = jax.nn.sigmoid(jnp.sum(w1_ref[...] * act, axis=0, keepdims=True))
    # F.interpolate to its own size == identity -> no-op.
    y = x * att
    y2 = jnp.dot(w2_ref[...], y, preferred_element_type=jnp.float32) + b2

    # In the zero-padded spatial region y2 == b2 exactly; subtract it from the
    # statistics analytically so the final GroupNorm matches the unpadded ref.
    pad_corr = None
    if pad_count:
        pad_corr = []
        for grp in range(num_groups):
            bb = b2[grp * cpg:(grp + 1) * cpg]
            pad_corr.append(
                (pad_count * jnp.sum(bb, axis=0, keepdims=True),
                 pad_count * jnp.sum(bb * bb, axis=0, keepdims=True)))

    sy, hy = _gn_fold(y2, gamma, beta, num_groups=num_groups, count=count,
                      pad_corr=pad_corr)
    o_ref[0] = (y2 * sy + hy).astype(o_ref.dtype)


# --------------------------------------------------------------------------
# 3-pass (tiled) kernels
# --------------------------------------------------------------------------
def _gw_stats_kernel(g_ref, wg_ref, gsum_ref, gsq_ref):
    """Pass 1: accumulate per-channel sum / sumsq of gw = Wg @ g over S tiles."""
    @pl.when(pl.program_id(2) == 0)
    def _():
        gsum_ref[...] = jnp.zeros_like(gsum_ref)
        gsq_ref[...] = jnp.zeros_like(gsq_ref)

    g = g_ref[0].astype(jnp.float32)
    gw = jnp.dot(wg_ref[...], g, preferred_element_type=jnp.float32)  # (Co, TS)
    gsum_ref[0] += jnp.sum(gw, axis=1, keepdims=True)
    gsq_ref[0] += jnp.sum(gw * gw, axis=1, keepdims=True)


def _main_kernel(x_ref, g_ref, wx_ref, wg_ref, w1_ref, w2_ref, b2_ref,
                 sg_ref, hg_ref, y2_ref, ysum_ref, ysq_ref):
    """Pass 2: attention gate + conv_2; also accumulate f32 stats of y2."""
    @pl.when(pl.program_id(2) == 0)
    def _():
        ysum_ref[...] = jnp.zeros_like(ysum_ref)
        ysq_ref[...] = jnp.zeros_like(ysq_ref)

    x = x_ref[0].astype(jnp.float32)                                 # (Cx, TS)
    g = g_ref[0].astype(jnp.float32)                                 # (Cg, TS)

    gw = jnp.dot(wg_ref[...], g, preferred_element_type=jnp.float32)
    g1 = gw * sg_ref[0] + hg_ref[0]          # GroupNorm(gw) folded (pass-1 stats)
    x1 = jnp.dot(wx_ref[...], x, preferred_element_type=jnp.float32)
    act = jnp.maximum(x1 + g1, 0.0)
    att = jax.nn.sigmoid(jnp.sum(w1_ref[...] * act, axis=0, keepdims=True))
    y = x * att                               # interpolate-to-self == identity
    y2 = jnp.dot(w2_ref[...], y, preferred_element_type=jnp.float32) + b2_ref[...]

    y2_ref[0] = y2.astype(y2_ref.dtype)       # lane-dense store (bf16 or f32)
    ysum_ref[0] += jnp.sum(y2, axis=1, keepdims=True)        # stats from f32 y2
    ysq_ref[0] += jnp.sum(y2 * y2, axis=1, keepdims=True)


def _apply_norm_kernel(y2_ref, sc_ref, sh_ref, o_ref):
    """Pass 3: apply the final GroupNorm (per-channel scale/shift)."""
    o_ref[0] = (y2_ref[0].astype(jnp.float32) * sc_ref[0]
                + sh_ref[0]).astype(o_ref.dtype)


# --------------------------------------------------------------------------
# Host-side glue
# --------------------------------------------------------------------------
def _finalize_group_stats(csum, csq, gamma, beta, valid_spatial, num_groups,
                          p_split, pad_count=0, b2=None):
    """(N*P, C, 1) partial sums/sumsq -> per-channel GroupNorm scale/shift."""
    npart, c, _ = csum.shape
    n = npart // p_split
    csum = csum.reshape(n, p_split, c, 1).sum(axis=1)                # (N, C, 1)
    csq = csq.reshape(n, p_split, c, 1).sum(axis=1)
    if pad_count and b2 is not None:
        csum = csum - pad_count * b2[None]
        csq = csq - pad_count * (b2 * b2)[None]
    cpg = c // num_groups
    count = float(valid_spatial * cpg)
    gs = csum.reshape(n, num_groups, cpg).sum(axis=2)                # (N, G)
    gq = csq.reshape(n, num_groups, cpg).sum(axis=2)
    mean = gs / count
    var = jnp.maximum(gq / count - mean * mean, 0.0)
    inv = jax.lax.rsqrt(var + EPS)
    mean_c = jnp.repeat(mean, cpg, axis=1)                           # (N, C)
    inv_c = jnp.repeat(inv, cpg, axis=1)
    scale = inv_c * gamma[None, :]
    shift = beta[None, :] - mean_c * scale
    return scale[:, :, None], shift[:, :, None]


def _pick_tile(s_pad, per_elem_bytes, budget_bytes, max_ts):
    """Largest multiple of 128 dividing s_pad, capped by max_ts and a VMEM
    budget (x2 for double buffering).  s_pad is always a multiple of 128, so
    this always terminates at a valid divisor (>= 128)."""
    cap = min(max_ts, s_pad,
              max(128, budget_bytes // max(per_elem_bytes * 2, 1)))
    ts = max(128, (cap // 128) * 128)
    while ts > 128 and s_pad % ts != 0:
        ts -= 128
    return ts


def _run_fused(x, g, params, *, num_groups, s_true, pad_count, out_dtype,
               vmem_limit):
    n, cx, s_pad = x.shape
    _, cg, _ = g.shape
    co = params["wx"].shape[0]
    gamma2 = params["gamma"].reshape(co, 1)
    beta2 = params["beta"].reshape(co, 1)

    kern = functools.partial(_fused_kernel, num_groups=num_groups,
                             valid_spatial=s_true, pad_count=pad_count)
    return pl.pallas_call(
        kern,
        out_shape=jax.ShapeDtypeStruct((n, co, s_pad), out_dtype),
        grid_spec=pltpu.PrefetchScalarGridSpec(
            num_scalar_prefetch=0,
            grid=(n,),
            in_specs=[
                pl.BlockSpec((1, cx, s_pad), lambda i: (i, 0, 0)),   # x
                pl.BlockSpec((1, cg, s_pad), lambda i: (i, 0, 0)),   # g
                pl.BlockSpec((co, cx), lambda i: (0, 0)),            # Wx
                pl.BlockSpec((co, cg), lambda i: (0, 0)),            # Wg
                pl.BlockSpec((co, 1), lambda i: (0, 0)),             # conv_1 w
                pl.BlockSpec((co, cx), lambda i: (0, 0)),            # conv_2 w
                pl.BlockSpec((co, 1), lambda i: (0, 0)),             # conv_2 b
                pl.BlockSpec((co, 1), lambda i: (0, 0)),             # gamma
                pl.BlockSpec((co, 1), lambda i: (0, 0)),             # beta
            ],
            out_specs=pl.BlockSpec((1, co, s_pad), lambda i: (i, 0, 0))),
        compiler_params=pltpu.CompilerParams(
            dimension_semantics=("parallel",),
            vmem_limit_bytes=vmem_limit),
    )(x, g, params["wx"], params["wg"], params["w1"], params["w2"],
      params["b2"], gamma2, beta2)


def _run_multipass(x, g, params, *, num_groups, s_true, pad_count, ts,
                   intermediate_dtype, out_dtype, vmem_limit):
    n, cx, s_pad = x.shape
    _, cg, _ = g.shape
    co = params["wx"].shape[0]
    ns = s_pad // ts
    # 2-way "parallel" S-split so both v7x TensorCores are busy even at N==1
    # (harmless on single-core v5e/v6e); each half gets its own partial stats.
    p_split = 2 if ns % 2 == 0 else 1
    nsj = ns // p_split

    cp_acc = pltpu.CompilerParams(
        dimension_semantics=("parallel", "parallel", "arbitrary"),
        vmem_limit_bytes=vmem_limit)

    # ---- Pass 1: statistics of gw = Wg(g) (pad region contributes zero) ----
    gsum, gsq = pl.pallas_call(
        _gw_stats_kernel,
        out_shape=(jax.ShapeDtypeStruct((n * p_split, co, 1), jnp.float32),
                   jax.ShapeDtypeStruct((n * p_split, co, 1), jnp.float32)),
        grid_spec=pltpu.PrefetchScalarGridSpec(
            num_scalar_prefetch=0,
            grid=(n, p_split, nsj),
            in_specs=[
                pl.BlockSpec((1, cg, ts), lambda i, p, j: (i, 0, p * nsj + j)),
                pl.BlockSpec((co, cg), lambda i, p, j: (0, 0)),
            ],
            out_specs=[
                pl.BlockSpec((1, co, 1), lambda i, p, j: (i * p_split + p, 0, 0)),
                pl.BlockSpec((1, co, 1), lambda i, p, j: (i * p_split + p, 0, 0)),
            ]),
        compiler_params=cp_acc,
    )(g, params["wg"])

    scale_g, shift_g = _finalize_group_stats(
        gsum, gsq, params["gamma"], params["beta"], s_true, num_groups, p_split)

    # ---- Pass 2: gate + conv_2 (y2 staged in HBM) + y2 statistics ----------
    y2, ysum, ysq = pl.pallas_call(
        _main_kernel,
        out_shape=(jax.ShapeDtypeStruct((n, co, s_pad), intermediate_dtype),
                   jax.ShapeDtypeStruct((n * p_split, co, 1), jnp.float32),
                   jax.ShapeDtypeStruct((n * p_split, co, 1), jnp.float32)),
        grid_spec=pltpu.PrefetchScalarGridSpec(
            num_scalar_prefetch=0,
            grid=(n, p_split, nsj),
            in_specs=[
                pl.BlockSpec((1, cx, ts), lambda i, p, j: (i, 0, p * nsj + j)),
                pl.BlockSpec((1, cg, ts), lambda i, p, j: (i, 0, p * nsj + j)),
                pl.BlockSpec((co, cx), lambda i, p, j: (0, 0)),
                pl.BlockSpec((co, cg), lambda i, p, j: (0, 0)),
                pl.BlockSpec((co, 1), lambda i, p, j: (0, 0)),
                pl.BlockSpec((co, cx), lambda i, p, j: (0, 0)),
                pl.BlockSpec((co, 1), lambda i, p, j: (0, 0)),
                pl.BlockSpec((1, co, 1), lambda i, p, j: (i, 0, 0)),
                pl.BlockSpec((1, co, 1), lambda i, p, j: (i, 0, 0)),
            ],
            out_specs=[
                pl.BlockSpec((1, co, ts), lambda i, p, j: (i, 0, p * nsj + j)),
                pl.BlockSpec((1, co, 1), lambda i, p, j: (i * p_split + p, 0, 0)),
                pl.BlockSpec((1, co, 1), lambda i, p, j: (i * p_split + p, 0, 0)),
            ]),
        compiler_params=cp_acc,
    )(x, g, params["wx"], params["wg"], params["w1"], params["w2"],
      params["b2"], scale_g, shift_g)

    scale_y, shift_y = _finalize_group_stats(
        ysum, ysq, params["gamma"], params["beta"], s_true, num_groups,
        p_split, pad_count=pad_count, b2=params["b2"])

    # ---- Pass 3: apply the final GroupNorm (alias y2 in place if possible) --
    io_alias = ({0: 0} if jnp.dtype(intermediate_dtype) == jnp.dtype(out_dtype)
                else {})
    out = pl.pallas_call(
        _apply_norm_kernel,
        out_shape=jax.ShapeDtypeStruct((n, co, s_pad), out_dtype),
        grid_spec=pltpu.PrefetchScalarGridSpec(
            num_scalar_prefetch=0,
            grid=(n, ns),
            in_specs=[
                pl.BlockSpec((1, co, ts), lambda i, j: (i, 0, j)),
                pl.BlockSpec((1, co, 1), lambda i, j: (i, 0, 0)),
                pl.BlockSpec((1, co, 1), lambda i, j: (i, 0, 0)),
            ],
            out_specs=pl.BlockSpec((1, co, ts), lambda i, j: (i, 0, j))),
        compiler_params=pltpu.CompilerParams(
            dimension_semantics=("parallel", "parallel"),
            vmem_limit_bytes=vmem_limit),
        input_output_aliases=io_alias,
    )(y2, scale_y, shift_y)
    return out


def attending_block_3d(x_ncs, g_ncs, params, *, num_groups,
                       out_dtype=jnp.float32, intermediate_dtype=None,
                       force_multipass=False, max_ts=65536):
    """x_ncs: (N, Cx, S), g_ncs: (N, Cg, S) (f32 or bf16) -> (N, Co, S)."""
    n, cx, s = x_ncs.shape
    _, cg, _ = g_ncs.shape
    co = params["wx"].shape[0]
    assert co % num_groups == 0
    if intermediate_dtype is None:
        intermediate_dtype = out_dtype

    # Pad S up to a lane-dense multiple of 128; statistics are pad-corrected.
    s_pad = ((s + 127) // 128) * 128
    pad_count = s_pad - s
    if pad_count:
        x_ncs = jnp.pad(x_ncs, ((0, 0), (0, 0), (0, pad_count)))
        g_ncs = jnp.pad(g_ncs, ((0, 0), (0, 0), (0, pad_count)))

    # VMEM budget (v5e/v6e: 128 MiB physical, v7x: 64 MiB).
    try:
        vmem_cap = int(pltpu.get_tpu_info().vmem_capacity_bytes)
    except Exception:
        vmem_cap = 64 * _MIB
    vmem_limit = int(0.85 * vmem_cap)

    bx = jnp.dtype(x_ncs.dtype).itemsize
    bg = jnp.dtype(g_ncs.dtype).itemsize
    bo = jnp.dtype(out_dtype).itemsize
    bi = jnp.dtype(intermediate_dtype).itemsize

    # Fused path if one sample (double-buffered I/O blocks + f32 temporaries)
    # fits in half the VMEM budget.
    fused_bytes = s_pad * (2 * (cx * bx + cg * bg + co * bo)
                           + 4 * (2 * cx + cg + 4 * co + 2))
    if (not force_multipass) and fused_bytes <= vmem_limit // 2:
        out = _run_fused(x_ncs, g_ncs, params, num_groups=num_groups,
                         s_true=s, pad_count=pad_count, out_dtype=out_dtype,
                         vmem_limit=vmem_limit)
    else:
        per_elem = cx * bx + cg * bg + co * bi
        ts = _pick_tile(s_pad, per_elem, vmem_limit // 2, max_ts)
        assert s_pad % ts == 0 and ts % 128 == 0
        out = _run_multipass(x_ncs, g_ncs, params, num_groups=num_groups,
                             s_true=s, pad_count=pad_count, ts=ts,
                             intermediate_dtype=intermediate_dtype,
                             out_dtype=out_dtype, vmem_limit=vmem_limit)

    if pad_count:
        out = out[:, :, :s]
    return out


# --------------------------------------------------------------------------
# Pure-JAX reference (same math, (N, C, S) layout, f32)
# --------------------------------------------------------------------------
def reference_jax(x, g, params, *, num_groups):
    gamma, beta = params["gamma"], params["beta"]

    def gn(v):  # v: (N, C, S)
        n, c, s = v.shape
        vg = v.reshape(n, num_groups, c // num_groups, s)
        mean = jnp.mean(vg, axis=(2, 3), keepdims=True)
        var = jnp.mean((vg - mean) ** 2, axis=(2, 3), keepdims=True)
        out = ((vg - mean) * jax.lax.rsqrt(var + EPS)).reshape(n, c, s)
        return out * gamma[None, :, None] + beta[None, :, None]

    x1 = jnp.einsum("oc,ncs->nos", params["wx"], x)
    gw = jnp.einsum("oc,ncs->nos", params["wg"], g)
    g1 = gn(gw)
    act = jnp.maximum(x1 + g1, 0.0)
    att = jax.nn.sigmoid(jnp.einsum("co,ncs->nos", params["w1"], act))
    y = x * att
    y2 = jnp.einsum("oc,ncs->nos", params["w2"], y) + params["b2"][None]
    return gn(y2)


# --------------------------------------------------------------------------
# Self-check
# --------------------------------------------------------------------------
if __name__ == "__main__":
    NUM_GROUPS = 2
    Cx, Cg = 4, 8
    Co = Cx   # default: out_channels = in_channels_x

    key = jax.random.PRNGKey(0)
    k1, k2, k3, k4, k5, k6, k7 = jax.random.split(key, 7)
    params = {
        "wx": 0.2 * jax.random.normal(k1, (Co, Cx), dtype=jnp.float32),
        "wg": 0.2 * jax.random.normal(k2, (Co, Cg), dtype=jnp.float32),
        "w1": 0.2 * jax.random.normal(k3, (Co, 1), dtype=jnp.float32),
        "w2": 0.2 * jax.random.normal(k4, (Co, Cx), dtype=jnp.float32),
        "b2": 0.1 * jax.random.normal(k5, (Co, 1), dtype=jnp.float32),
        "gamma": 1.0 + 0.1 * jax.random.normal(k6, (Co,), dtype=jnp.float32),
        "beta": 0.1 * jax.random.normal(k7, (Co,), dtype=jnp.float32),
    }

    def make_inputs(seed, n, d, h, w):
        kx, kg = jax.random.split(jax.random.PRNGKey(seed))
        s = d * h * w
        x = jax.random.normal(kx, (n, Cx, d, h, w), jnp.float32).reshape(n, Cx, s)
        g = jax.random.normal(kg, (n, Cg, d, h, w), jnp.float32).reshape(n, Cg, s)
        # bf16 streaming at the kernel boundary (kernel is HBM-bandwidth
        # bound); all in-kernel math / GroupNorm statistics stay in f32.
        return x.astype(jnp.bfloat16), g.astype(jnp.bfloat16)

    def check(name, x, g, tol, **kw):
        run = jax.jit(lambda xx, gg: attending_block_3d(
            xx, gg, params, num_groups=NUM_GROUPS, **kw))
        out = jax.block_until_ready(run(x, g))
        ref = reference_jax(x.astype(jnp.float32), g.astype(jnp.float32),
                            params, num_groups=NUM_GROUPS)
        assert out.shape == ref.shape, (name, out.shape, ref.shape)
        err = float(jnp.max(jnp.abs(out.astype(jnp.float32) - ref)))
        assert err < tol, (name, err)

    # A) small volume -> fused single-kernel path (only x, g, out touch HBM).
    xa, ga = make_inputs(0, 2, 8, 8, 8)                       # S = 512
    check("fused", xa, ga, 3e-3)

    # B) forced 3-pass tiled path (+ 2-way S-split, y2 aliased in place).
    xb, gb = make_inputs(1, 2, 16, 16, 16)                    # S = 4096
    check("multipass", xb, gb, 3e-3, force_multipass=True, max_ts=1024)

    # C) bf16 y2 staging buffer (halves y2 HBM traffic; stats stay f32).
    check("multipass_bf16_y2", xb, gb, 5e-2, force_multipass=True,
          max_ts=1024, intermediate_dtype=jnp.bfloat16)

    # D) spatial size not a multiple of 128 -> padded + stat-corrected.
    xc, gc = make_inputs(2, 1, 5, 6, 7)                       # S = 210
    check("fused_pad", xc, gc, 3e-3)
    check("multipass_pad", xc, gc, 3e-3, force_multipass=True, max_ts=128)

    print("KERNEL_OK")
</pallas_src>

<mosaic_0001>
module attributes {stable_mosaic.version = 11 : i64} {
  func.func @_fused_kernel(%arg0: i32, %arg1: memref<1x4x512xbf16, #tpu.memory_space<vmem>>, %arg2: memref<1x8x512xbf16, #tpu.memory_space<vmem>>, %arg3: memref<4x4xf32, #tpu.memory_space<vmem>>, %arg4: memref<4x8xf32, #tpu.memory_space<vmem>>, %arg5: memref<4x1xf32, #tpu.memory_space<vmem>>, %arg6: memref<4x4xf32, #tpu.memory_space<vmem>>, %arg7: memref<4x1xf32, #tpu.memory_space<vmem>>, %arg8: memref<4x1xf32, #tpu.memory_space<vmem>>, %arg9: memref<4x1xf32, #tpu.memory_space<vmem>>, %arg10: memref<1x4x512xf32, #tpu.memory_space<vmem>>) attributes {dimension_semantics = [#tpu.dimension_semantics<parallel>], iteration_bounds = array<i64: 2>, scalar_prefetch = 0 : i64, scratch_operands = 0 : i64, tpu.core_type = #tpu.core_type<tc>, window_params = [{transform_indices = @transform_0, window_bounds = array<i64: 1, 4, 512>}, {transform_indices = @transform_1, window_bounds = array<i64: 1, 8, 512>}, {pipeline_mode = #tpu.pipeline_mode<synchronous>, transform_indices = @transform_2, window_bounds = array<i64: 4, 4>}, {pipeline_mode = #tpu.pipeline_mode<synchronous>, transform_indices = @transform_3, window_bounds = array<i64: 4, 8>}, {pipeline_mode = #tpu.pipeline_mode<synchronous>, transform_indices = @transform_4, window_bounds = array<i64: 4, 1>}, {pipeline_mode = #tpu.pipeline_mode<synchronous>, transform_indices = @transform_5, window_bounds = array<i64: 4, 4>}, {pipeline_mode = #tpu.pipeline_mode<synchronous>, transform_indices = @transform_6, window_bounds = array<i64: 4, 1>}, {pipeline_mode = #tpu.pipeline_mode<synchronous>, transform_indices = @transform_7, window_bounds = array<i64: 4, 1>}, {pipeline_mode = #tpu.pipeline_mode<synchronous>, transform_indices = @transform_8, window_bounds = array<i64: 4, 1>}, {transform_indices = @transform_9, window_bounds = array<i64: 1, 4, 512>}]} {
    %c0 = arith.constant 0 : index
    %c0_0 = arith.constant 0 : index
    %c0_1 = arith.constant 0 : index
    %0 = vector.load %arg1[%c0, %c0_0, %c0_1] : memref<1x4x512xbf16, #tpu.memory_space<vmem>>, vector<1x4x512xbf16>
    %1 = vector.shape_cast %0 : vector<1x4x512xbf16> to vector<4x512xbf16>
    %2 = arith.extf %1 : vector<4x512xbf16> to vector<4x512xf32>
    %c0_2 = arith.constant 0 : index
    %c0_3 = arith.constant 0 : index
    %c0_4 = arith.constant 0 : index
    %3 = vector.load %arg2[%c0_2, %c0_3, %c0_4] : memref<1x8x512xbf16, #tpu.memory_space<vmem>>, vector<1x8x512xbf16>
    %4 = vector.shape_cast %3 : vector<1x8x512xbf16> to vector<8x512xbf16>
    %5 = arith.extf %4 : vector<8x512xbf16> to vector<8x512xf32>
    %c0_5 = arith.constant 0 : index
    %c0_6 = arith.constant 0 : index
    %6 = vector.load %arg8[%c0_5, %c0_6] : memref<4x1xf32, #tpu.memory_space<vmem>>, vector<4x1xf32>
    %c0_7 = arith.constant 0 : index
    %c0_8 = arith.constant 0 : index
    %7 = vector.load %arg9[%c0_7, %c0_8] : memref<4x1xf32, #tpu.memory_space<vmem>>, vector<4x1xf32>
    %c0_9 = arith.constant 0 : index
    %c0_10 = arith.constant 0 : index
    %8 = vector.load %arg7[%c0_9, %c0_10] : memref<4x1xf32, #tpu.memory_space<vmem>>, vector<4x1xf32>
    %c0_11 = arith.constant 0 : index
    %c0_12 = arith.constant 0 : index
    %9 = vector.load %arg4[%c0_11, %c0_12] : memref<4x8xf32, #tpu.memory_space<vmem>>, vector<4x8xf32>
    %cst = arith.constant dense<0.000000e+00> : vector<4x512xf32>
    %10 = tpu.matmul %9, %5, %cst {dimension_numbers = #tpu.dot_dimension_numbers<[1], [0], [0], [1], [0, 0, 1, 1], [], []>} : vector<4x8xf32>, vector<8x512xf32>, vector<4x512xf32> -> vector<4x512xf32>
    %11 = tpu.iota {dimensions = array<i32: 0>} : vector<4x1xi32>
    %cst_13 = arith.constant 0.000000e+00 : f32
    %12 = vector.broadcast %cst_13 : f32 to vector<4x1xf32>
    %cst_14 = arith.constant 0.000000e+00 : f32
    %13 = vector.broadcast %cst_14 : f32 to vector<4x1xf32>
    %14 = vector.extract_strided_slice %10 {offsets = [0, 0], sizes = [2, 512], strides = [1, 1]} : vector<4x512xf32> to vector<2x512xf32>
    %cst_15 = arith.constant dense<0.000000e+00> : vector<2xf32>
    %15 = vector.multi_reduction <add>, %14, %cst_15 [1] : vector<2x512xf32> to vector<2xf32>
    %16 = vector.shape_cast %15 : vector<2xf32> to vector<2x1xf32>
    %cst_16 = arith.constant dense<0.000000e+00> : vector<1xf32>
    %17 = vector.multi_reduction <add>, %16, %cst_16 [0] : vector<2x1xf32> to vector<1xf32>
    %18 = vector.shape_cast %17 : vector<1xf32> to vector<1x1xf32>
    %19 = arith.mulf %14, %14 : vector<2x512xf32>
    %cst_17 = arith.constant dense<0.000000e+00> : vector<2xf32>
    %20 = vector.multi_reduction <add>, %19, %cst_17 [1] : vector<2x512xf32> to vector<2xf32>
    %21 = vector.shape_cast %20 : vector<2xf32> to vector<2x1xf32>
    %cst_18 = arith.constant dense<0.000000e+00> : vector<1xf32>
    %22 = vector.multi_reduction <add>, %21, %cst_18 [0] : vector<2x1xf32> to vector<1xf32>
    %23 = vector.shape_cast %22 : vector<1xf32> to vector<1x1xf32>
    %cst_19 = arith.constant 1.024000e+03 : f32
    %24 = vector.broadcast %cst_19 : f32 to vector<1x1xf32>
    %25 = arith.divf %18, %24 : vector<1x1xf32>
    %cst_20 = arith.constant 1.024000e+03 : f32
    %26 = vector.broadcast %cst_20 : f32 to vector<1x1xf32>
    %27 = arith.divf %23, %26 : vector<1x1xf32>
    %28 = arith.mulf %25, %25 : vector<1x1xf32>
    %29 = arith.subf %27, %28 : vector<1x1xf32>
    %cst_21 = arith.constant 0.000000e+00 : f32
    %30 = vector.broadcast %cst_21 : f32 to vector<1x1xf32>
    %31 = arith.maximumf %29, %30 : vector<1x1xf32>
    %cst_22 = arith.constant 9.99999974E-6 : f32
    %32 = vector.broadcast %cst_22 : f32 to vector<1x1xf32>
    %33 = arith.addf %31, %32 : vector<1x1xf32>
    %34 = math.rsqrt %33 : vector<1x1xf32>
    %c0_i32 = arith.constant 0 : i32
    %35 = vector.broadcast %c0_i32 : i32 to vector<4x1xi32>
    %36 = arith.cmpi sge, %11, %35 : vector<4x1xi32>
    %c2_i32 = arith.constant 2 : i32
    %37 = vector.broadcast %c2_i32 : i32 to vector<4x1xi32>
    %38 = arith.cmpi slt, %11, %37 : vector<4x1xi32>
    %39 = arith.andi %36, %38 : vector<4x1xi1>
    %40 = vector.broadcast %34 : vector<1x1xf32> to vector<4x1xf32>
    %41 = arith.mulf %40, %6 : vector<4x1xf32>
    %42 = arith.select %39, %41, %12 : vector<4x1xi1>, vector<4x1xf32>
    %43 = arith.mulf %25, %34 : vector<1x1xf32>
    %44 = vector.broadcast %43 : vector<1x1xf32> to vector<4x1xf32>
    %45 = arith.mulf %44, %6 : vector<4x1xf32>
    %46 = arith.subf %7, %45 : vector<4x1xf32>
    %47 = arith.select %39, %46, %13 : vector<4x1xi1>, vector<4x1xf32>
    %48 = vector.extract_strided_slice %10 {offsets = [2, 0], sizes = [2, 512], strides = [1, 1]} : vector<4x512xf32> to vector<2x512xf32>
    %cst_23 = arith.constant dense<0.000000e+00> : vector<2xf32>
    %49 = vector.multi_reduction <add>, %48, %cst_23 [1] : vector<2x512xf32> to vector<2xf32>
    %50 = vector.shape_cast %49 : vector<2xf32> to vector<2x1xf32>
    %cst_24 = arith.constant dense<0.000000e+00> : vector<1xf32>
    %51 = vector.multi_reduction <add>, %50, %cst_24 [0] : vector<2x1xf32> to vector<1xf32>
    %52 = vector.shape_cast %51 : vector<1xf32> to vector<1x1xf32>
    %53 = arith.mulf %48, %48 : vector<2x512xf32>
    %cst_25 = arith.constant dense<0.000000e+00> : vector<2xf32>
    %54 = vector.multi_reduction <add>, %53, %cst_25 [1] : vector<2x512xf32> to vector<2xf32>
    %55 = vector.shape_cast %54 : vector<2xf32> to vector<2x1xf32>
    %cst_26 = arith.constant dense<0.000000e+00> : vector<1xf32>
    %56 = vector.multi_reduction <add>, %55, %cst_26 [0] : vector<2x1xf32> to vector<1xf32>
    %57 = vector.shape_cast %56 : vector<1xf32> to vector<1x1xf32>
    %cst_27 = arith.constant 1.024000e+03 : f32
    %58 = vector.broadcast %cst_27 : f32 to vector<1x1xf32>
    %59 = arith.divf %52, %58 : vector<1x1xf32>
    %cst_28 = arith.constant 1.024000e+03 : f32
    %60 = vector.broadcast %cst_28 : f32 to vector<1x1xf32>
    %61 = arith.divf %57, %60 : vector<1x1xf32>
    %62 = arith.mulf %59, %59 : vector<1x1xf32>
    %63 = arith.subf %61, %62 : vector<1x1xf32>
    %cst_29 = arith.constant 0.000000e+00 : f32
    %64 = vector.broadcast %cst_29 : f32 to vector<1x1xf32>
    %65 = arith.maximumf %63, %64 : vector<1x1xf32>
    %cst_30 = arith.constant 9.99999974E-6 : f32
    %66 = vector.broadcast %cst_30 : f32 to vector<1x1xf32>
    %67 = arith.addf %65, %66 : vector<1x1xf32>
    %68 = math.rsqrt %67 : vector<1x1xf32>
    %c2_i32_31 = arith.constant 2 : i32
    %69 = vector.broadcast %c2_i32_31 : i32 to vector<4x1xi32>
    %70 = arith.cmpi sge, %11, %69 : vector<4x1xi32>
    %c4_i32 = arith.constant 4 : i32
    %71 = vector.broadcast %c4_i32 : i32 to vector<4x1xi32>
    %72 = arith.cmpi slt, %11, %71 : vector<4x1xi32>
    %73 = arith.andi %70, %72 : vector<4x1xi1>
    %74 = vector.broadcast %68 : vector<1x1xf32> to vector<4x1xf32>
    %75 = arith.mulf %74, %6 : vector<4x1xf32>
    %76 = arith.select %73, %75, %42 : vector<4x1xi1>, vector<4x1xf32>
    %77 = arith.mulf %59, %68 : vector<1x1xf32>
    %78 = vector.broadcast %77 : vector<1x1xf32> to vector<4x1xf32>
    %79 = arith.mulf %78, %6 : vector<4x1xf32>
    %80 = arith.subf %7, %79 : vector<4x1xf32>
    %81 = arith.select %73, %80, %47 : vector<4x1xi1>, vector<4x1xf32>
    %82 = vector.broadcast %76 : vector<4x1xf32> to vector<4x512xf32>
    %83 = arith.mulf %10, %82 : vector<4x512xf32>
    %84 = vector.broadcast %81 : vector<4x1xf32> to vector<4x512xf32>
    %85 = arith.addf %83, %84 : vector<4x512xf32>
    %c0_32 = arith.constant 0 : index
    %c0_33 = arith.constant 0 : index
    %86 = vector.load %arg3[%c0_32, %c0_33] : memref<4x4xf32, #tpu.memory_space<vmem>>, vector<4x4xf32>
    %cst_34 = arith.constant dense<0.000000e+00> : vector<4x512xf32>
    %87 = tpu.matmul %86, %2, %cst_34 {dimension_numbers = #tpu.dot_dimension_numbers<[1], [0], [0], [1], [0, 0, 1, 1], [], []>} : vector<4x4xf32>, vector<4x512xf32>, vector<4x512xf32> -> vector<4x512xf32>
    %88 = arith.addf %87, %85 : vector<4x512xf32>
    %cst_35 = arith.constant 0.000000e+00 : f32
    %89 = vector.broadcast %cst_35 : f32 to vector<4x512xf32>
    %90 = arith.maximumf %88, %89 : vector<4x512xf32>
    %c0_36 = arith.constant 0 : index
    %c0_37 = arith.constant 0 : index
    %91 = vector.load %arg5[%c0_36, %c0_37] : memref<4x1xf32, #tpu.memory_space<vmem>>, vector<4x1xf32>
    %92 = vector.broadcast %91 : vector<4x1xf32> to vector<4x512xf32>
    %93 = arith.mulf %92, %90 : vector<4x512xf32>
    %cst_38 = arith.constant dense<0.000000e+00> : vector<512xf32>
    %94 = vector.multi_reduction <add>, %93, %cst_38 [0] : vector<4x512xf32> to vector<512xf32>
    %95 = vector.shape_cast %94 : vector<512xf32> to vector<1x512xf32>
    %96 = arith.negf %95 : vector<1x512xf32>
    %97 = math.exp %96 : vector<1x512xf32>
    %cst_39 = arith.constant 1.000000e+00 : f32
    %98 = vector.broadcast %cst_39 : f32 to vector<1x512xf32>
    %99 = arith.addf %98, %97 : vector<1x512xf32>
    %100 = arith.divf %98, %99 : vector<1x512xf32>
    %101 = vector.broadcast %100 : vector<1x512xf32> to vector<4x512xf32>
    %102 = arith.mulf %2, %101 : vector<4x512xf32>
    %c0_40 = arith.constant 0 : index
    %c0_41 = arith.constant 0 : index
    %103 = vector.load %arg6[%c0_40, %c0_41] : memref<4x4xf32, #tpu.memory_space<vmem>>, vector<4x4xf32>
    %cst_42 = arith.constant dense<0.000000e+00> : vector<4x512xf32>
    %104 = tpu.matmul %103, %102, %cst_42 {dimension_numbers = #tpu.dot_dimension_numbers<[1], [0], [0], [1], [0, 0, 1, 1], [], []>} : vector<4x4xf32>, vector<4x512xf32>, vector<4x512xf32> -> vector<4x512xf32>
    %105 = vector.broadcast %8 : vector<4x1xf32> to vector<4x512xf32>
    %106 = arith.addf %104, %105 : vector<4x512xf32>
    %107 = tpu.iota {dimensions = array<i32: 0>} : vector<4x1xi32>
    %cst_43 = arith.constant 0.000000e+00 : f32
    %108 = vector.broadcast %cst_43 : f32 to vector<4x1xf32>
    %cst_44 = arith.constant 0.000000e+00 : f32
    %109 = vector.broadcast %cst_44 : f32 to vector<4x1xf32>
    %110 = vector.extract_strided_slice %106 {offsets = [0, 0], sizes = [2, 512], strides = [1, 1]} : vector<4x512xf32> to vector<2x512xf32>
    %cst_45 = arith.constant dense<0.000000e+00> : vector<2xf32>
    %111 = vector.multi_reduction <add>, %110, %cst_45 [1] : vector<2x512xf32> to vector<2xf32>
    %112 = vector.shape_cast %111 : vector<2xf32> to vector<2x1xf32>
    %cst_46 = arith.constant dense<0.000000e+00> : vector<1xf32>
    %113 = vector.multi_reduction <add>, %112, %cst_46 [0] : vector<2x1xf32> to vector<1xf32>
    %114 = vector.shape_cast %113 : vector<1xf32> to vector<1x1xf32>
    %115 = arith.mulf %110, %110 : vector<2x512xf32>
    %cst_47 = arith.constant dense<0.000000e+00> : vector<2xf32>
    %116 = vector.multi_reduction <add>, %115, %cst_47 [1] : vector<2x512xf32> to vector<2xf32>
    %117 = vector.shape_cast %116 : vector<2xf32> to vector<2x1xf32>
    %cst_48 = arith.constant dense<0.000000e+00> : vector<1xf32>
    %118 = vector.multi_reduction <add>, %117, %cst_48 [0] : vector<2x1xf32> to vector<1xf32>
    %119 = vector.shape_cast %118 : vector<1xf32> to vector<1x1xf32>
    %cst_49 = arith.constant 1.024000e+03 : f32
    %120 = vector.broadcast %cst_49 : f32 to vector<1x1xf32>
    %121 = arith.divf %114, %120 : vector<1x1xf32>
    %cst_50 = arith.constant 1.024000e+03 : f32
    %122 = vector.broadcast %cst_50 : f32 to vector<1x1xf32>
    %123 = arith.divf %119, %122 : vector<1x1xf32>
    %124 = arith.mulf %121, %121 : vector<1x1xf32>
    %125 = arith.subf %123, %124 : vector<1x1xf32>
    %cst_51 = arith.constant 0.000000e+00 : f32
    %126 = vector.broadcast %cst_51 : f32 to vector<1x1xf32>
    %127 = arith.maximumf %125, %126 : vector<1x1xf32>
    %cst_52 = arith.constant 9.99999974E-6 : f32
    %128 = vector.broadcast %cst_52 : f32 to vector<1x1xf32>
    %129 = arith.addf %127, %128 : vector<1x1xf32>
    %130 = math.rsqrt %129 : vector<1x1xf32>
    %c0_i32_53 = arith.constant 0 : i32
    %131 = vector.broadcast %c0_i32_53 : i32 to vector<4x1xi32>
    %132 = arith.cmpi sge, %107, %131 : vector<4x1xi32>
    %c2_i32_54 = arith.constant 2 : i32
    %133 = vector.broadcast %c2_i32_54 : i32 to vector<4x1xi32>
    %134 = arith.cmpi slt, %107, %133 : vector<4x1xi32>
    %135 = arith.andi %132, %134 : vector<4x1xi1>
    %136 = vector.broadcast %130 : vector<1x1xf32> to vector<4x1xf32>
    %137 = arith.mulf %136, %6 : vector<4x1xf32>
    %138 = arith.select %135, %137, %108 : vector<4x1xi1>, vector<4x1xf32>
    %139 = arith.mulf %121, %130 : vector<1x1xf32>
    %140 = vector.broadcast %139 : vector<1x1xf32> to vector<4x1xf32>
    %141 = arith.mulf %140, %6 : vector<4x1xf32>
    %142 = arith.subf %7, %141 : vector<4x1xf32>
    %143 = arith.select %135, %142, %109 : vector<4x1xi1>, vector<4x1xf32>
    %144 = vector.extract_strided_slice %106 {offsets = [2, 0], sizes = [2, 512], strides = [1, 1]} : vector<4x512xf32> to vector<2x512xf32>
    %cst_55 = arith.constant dense<0.000000e+00> : vector<2xf32>
    %145 = vector.multi_reduction <add>, %144, %cst_55 [1] : vector<2x512xf32> to vector<2xf32>
    %146 = vector.shape_cast %145 : vector<2xf32> to vector<2x1xf32>
    %cst_56 = arith.constant dense<0.000000e+00> : vector<1xf32>
    %147 = vector.multi_reduction <add>, %146, %cst_56 [0] : vector<2x1xf32> to vector<1xf32>
    %148 = vector.shape_cast %147 : vector<1xf32> to vector<1x1xf32>
    %149 = arith.mulf %144, %144 : vector<2x512xf32>
    %cst_57 = arith.constant dense<0.000000e+00> : vector<2xf32>
    %150 = vector.multi_reduction <add>, %149, %cst_57 [1] : vector<2x512xf32> to vector<2xf32>
    %151 = vector.shape_cast %150 : vector<2xf32> to vector<2x1xf32>
    %cst_58 = arith.constant dense<0.000000e+00> : vector<1xf32>
    %152 = vector.multi_reduction <add>, %151, %cst_58 [0] : vector<2x1xf32> to vector<1xf32>
    %153 = vector.shape_cast %152 : vector<1xf32> to vector<1x1xf32>
    %cst_59 = arith.constant 1.024000e+03 : f32
    %154 = vector.broadcast %cst_59 : f32 to vector<1x1xf32>
    %155 = arith.divf %148, %154 : vector<1x1xf32>
    %cst_60 = arith.constant 1.024000e+03 : f32
    %156 = vector.broadcast %cst_60 : f32 to vector<1x1xf32>
    %157 = arith.divf %153, %156 : vector<1x1xf32>
    %158 = arith.mulf %155, %155 : vector<1x1xf32>
    %159 = arith.subf %157, %158 : vector<1x1xf32>
    %cst_61 = arith.constant 0.000000e+00 : f32
    %160 = vector.broadcast %cst_61 : f32 to vector<1x1xf32>
    %161 = arith.maximumf %159, %160 : vector<1x1xf32>
    %cst_62 = arith.constant 9.99999974E-6 : f32
    %162 = vector.broadcast %cst_62 : f32 to vector<1x1xf32>
    %163 = arith.addf %161, %162 : vector<1x1xf32>
    %164 = math.rsqrt %163 : vector<1x1xf32>
    %c2_i32_63 = arith.constant 2 : i32
    %165 = vector.broadcast %c2_i32_63 : i32 to vector<4x1xi32>
    %166 = arith.cmpi sge, %107, %165 : vector<4x1xi32>
    %c4_i32_64 = arith.constant 4 : i32
    %167 = vector.broadcast %c4_i32_64 : i32 to vector<4x1xi32>
    %168 = arith.cmpi slt, %107, %167 : vector<4x1xi32>
    %169 = arith.andi %166, %168 : vector<4x1xi1>
    %170 = vector.broadcast %164 : vector<1x1xf32> to vector<4x1xf32>
    %171 = arith.mulf %170, %6 : vector<4x1xf32>
    %172 = arith.select %169, %171, %138 : vector<4x1xi1>, vector<4x1xf32>
    %173 = arith.mulf %155, %164 : vector<1x1xf32>
    %174 = vector.broadcast %173 : vector<1x1xf32> to vector<4x1xf32>
    %175 = arith.mulf %174, %6 : vector<4x1xf32>
    %176 = arith.subf %7, %175 : vector<4x1xf32>
    %177 = arith.select %169, %176, %143 : vector<4x1xi1>, vector<4x1xf32>
    %178 = vector.broadcast %172 : vector<4x1xf32> to vector<4x512xf32>
    %179 = arith.mulf %106, %178 : vector<4x512xf32>
    %180 = vector.broadcast %177 : vector<4x1xf32> to vector<4x512xf32>
    %181 = arith.addf %179, %180 : vector<4x512xf32>
    %c0_65 = arith.constant 0 : index
    %c0_66 = arith.constant 0 : index
    %c0_67 = arith.constant 0 : index
    %182 = vector.load %arg10[%c0_65, %c0_66, %c0_67] : memref<1x4x512xf32, #tpu.memory_space<vmem>>, vector<1x4x512xf32>
    %183 = vector.shape_cast %182 : vector<1x4x512xf32> to vector<4x512xf32>
    %184 = vector.shape_cast %181 : vector<4x512xf32> to vector<1x4x512xf32>
    tpu.vector_store %arg10[%c0_65, %c0_66, %c0_67], %184 {strides = array<i32>} : memref<1x4x512xf32, #tpu.memory_space<vmem>>, vector<1x4x512xf32>,
    return
  }
  func.func @transform_0(%arg0: i32) -> (i32, i32, i32) {
    %c0_i32 = arith.constant 0 : i32
    %c0_i32_0 = arith.constant 0 : i32
    %c0_i32_1 = arith.constant 0 : i32
    return %arg0, %c0_i32, %c0_i32_0 : i32, i32, i32
  }
  func.func @transform_1(%arg0: i32) -> (i32, i32, i32) {
    %c0_i32 = arith.constant 0 : i32
    %c0_i32_0 = arith.constant 0 : i32
    %c0_i32_1 = arith.constant 0 : i32
    return %arg0, %c0_i32, %c0_i32_0 : i32, i32, i32
  }
  func.func @transform_2(%arg0: i32) -> (i32, i32) {
    %c0_i32 = arith.constant 0 : i32
    %c0_i32_0 = arith.constant 0 : i32
    %c0_i32_1 = arith.constant 0 : i32
    return %c0_i32, %c0_i32_0 : i32, i32
  }
  func.func @transform_3(%arg0: i32) -> (i32, i32) {
    %c0_i32 = arith.constant 0 : i32
    %c0_i32_0 = arith.constant 0 : i32
    %c0_i32_1 = arith.constant 0 : i32
    return %c0_i32, %c0_i32_0 : i32, i32
  }
  func.func @transform_4(%arg0: i32) -> (i32, i32) {
    %c0_i32 = arith.constant 0 : i32
    %c0_i32_0 = arith.constant 0 : i32
    %c0_i32_1 = arith.constant 0 : i32
    return %c0_i32, %c0_i32_0 : i32, i32
  }
  func.func @transform_5(%arg0: i32) -> (i32, i32) {
    %c0_i32 = arith.constant 0 : i32
    %c0_i32_0 = arith.constant 0 : i32
    %c0_i32_1 = arith.constant 0 : i32
    return %c0_i32, %c0_i32_0 : i32, i32
  }
  func.func @transform_6(%arg0: i32) -> (i32, i32) {
    %c0_i32 = arith.constant 0 : i32
    %c0_i32_0 = arith.constant 0 : i32
    %c0_i32_1 = arith.constant 0 : i32
    return %c0_i32, %c0_i32_0 : i32, i32
  }
  func.func @transform_7(%arg0: i32) -> (i32, i32) {
    %c0_i32 = arith.constant 0 : i32
    %c0_i32_0 = arith.constant 0 : i32
    %c0_i32_1 = arith.constant 0 : i32
    return %c0_i32, %c0_i32_0 : i32, i32
  }
  func.func @transform_8(%arg0: i32) -> (i32, i32) {
    %c0_i32 = arith.constant 0 : i32
    %c0_i32_0 = arith.constant 0 : i32
    %c0_i32_1 = arith.constant 0 : i32
    return %c0_i32, %c0_i32_0 : i32, i32
  }
  func.func @transform_9(%arg0: i32) -> (i32, i32, i32) {
    %c0_i32 = arith.constant 0 : i32
    %c0_i32_0 = arith.constant 0 : i32
    %c0_i32_1 = arith.constant 0 : i32
    return %arg0, %c0_i32, %c0_i32_0 : i32, i32, i32
  }
}

</mosaic_0001>

<bundles_post_ra>
// kernel: _lambda_.1
= control target key start
LH: loop header
LB: loop body
LE: loop exit
PB: predicated region body
PF: predicated region fallthrough
CT: control target
= control target key end

     0   :  { %s2286_s0 = inlined_call_operand.hbm [shape: bf16[2,4,512], index: 0, kind: input, shape index: {}]   ;;  %s2287_s1 = inlined_call_operand.hbm [shape: bf16[2,8,512], index: 1, kind: input, shape index: {}]   ;;  %s2288_s2 = inlined_call_operand.hbm [shape: f32[4,4], index: 2, kind: input, shape index: {}]   ;;  %s2289_s3 = inlined_call_operand.hbm [shape: f32[4,8], index: 3, kind: input, shape index: {}]   ;;  %s2290_s4 = inlined_call_operand.hbm [shape: f32[4,1], index: 4, kind: input, shape index: {}]   ;;  %s2291_s5 = inlined_call_operand.vmem [shape: f32[4,4], index: 5, kind: input, shape index: {}]   ;;  %s2292_s6 = inlined_call_operand.vmem [shape: f32[4,1], index: 6, kind: input, shape index: {}]   ;;  %s2293_s7 = inlined_call_operand.vmem [shape: f32[4,1], index: 7, kind: input, shape index: {}]   ;;  %s2294_s8 = inlined_call_operand.vmem [shape: f32[4,1], index: 8, kind: input, shape index: {}]   ;;  %s2295_s9 = inlined_call_operand.hbm [shape: f32[2,4,512], index: 9, kind: output, shape index: {}]  }
   0x1   :  { %2301 = sst [smem:[#allocation18_spill]] %s2286_s0 }
   0x2   :  { %2302 = sst [smem:[#allocation19_spill]] %s2288_s2 }
   0x3   :  { %2303 = sst [smem:[#allocation20_spill]] %s2289_s3 }
   0x4   :  { %2304 = sst [smem:[#allocation21_spill]] %s2290_s4 }
   0x5   :  { %14 = vsyncpa [#allocation3], 0 }
   0x6   :  { %16 = vsyncpa [#allocation3 + $0x1], 0 }
   0x7   :  { %17 = vsyncpa [#allocation6], 0 }
   0x8   :  { %19 = vsyncpa [#allocation6 + $0x1], 0 }
   0x9   :  { %20 = vsyncpa [#allocation9], 0 }
   0xa   :  { %21 = vsyncpa [#allocation4], 0 }
   0xb   :  { %23 = vsyncpa [#allocation4 + $0x1], 0  ;;  %s1812_s30 = smov 0   ;;  %s1814_s10 = smov 0  }
   0xc   :  { %s1816_s11 = smov 0   ;;  %s1818_s12 = smov 0  }
   0xd LB: > { %s1833_s13 = sadd.s32 4294967295, %s1752_s12   ;;  %s1375_s14 = sadd.s32 4294967294, %s1752_s12   ;;  %s1752_s12 = sphi %s1818_s12, %s2334_s12   ;;  %s1748_s11 = sphi %s1816_s11, %s2333_s11   ;;  %s1744_s10 = sphi %s1814_s10, %s2332_s10   ;;  %s1740_s30 = sphi %s1812_s30, %s2331_s30  }
   0xe   : > { %p49_p0 = scmp.ne.s32.totalorder %s1744_s10, %s1740_s30  ;;  %p2296_p1 = scmp.eq.s32.totalorder %s1833_s13, 0 }
   0xf   : > { %p252_p3 = scmp.eq.s32.totalorder %s1375_s14, 1  ;;  %p1376_p5 = scmp.ge.s32.totalorder %s1752_s12, 1 }
  0x10   : > { %p1842_p4 = por %p2296_p1, %p49_p0  ;;  %p259_p7 = scmp.lt.s32.totalorder %s1752_s12, 3 }
  0x11   : > { %p1847_p6 = por %p252_p3, %p49_p0  ;;  %s1754_s18 = smov [#allocation7]  }
  0x12   : > { %s2305_s15 = scalar_select %p1842_p4, 1, 0 }
  0x13   : > { %s2306_s16 = scalar_select %p1847_p6, 1, 0 }
  0x14   : > { %p1852_p8 = pnand %p1376_p5, %p259_p7  ;;  %s272_s19 = sshll.u32 %s1754_s18, 4  ;;  %s273_s19 = int_to_ptr.vmem [resolvable:$true] %s272_s19 }
  0x15   : > { %2307 = sst [smem:[#allocation17_spill]] %s2306_s16  ;;  %s1755_s20 = smov [#allocation8]  }
  0x16   : > { %s2308_s17 = scalar_select %p1852_p8, 1, 0 }
  0x17   : > { %p1438_p10 = pneg %p1852_p8  ;;  %s283_s21 = sshll.u32 %s1755_s20, 4  ;;  %s1865_s21 = int_to_ptr.vmem [resolvable:$true] %s283_s21 }
  0x18   : > { %s1756_s23 = smov [#allocation10]   ;;  %s2310_s2 = sld [smem:[#allocation19_spill]] }
  0x19   : > { %p1861_p11 = pnand %p1438_p10, %p2296_p1  ;;  %s294_s24 = sshll.u32 %s1756_s23, 4  ;;  %s1867_s24 = int_to_ptr.vmem [resolvable:$true] %s294_s24 }
  0x1b   : > { %p1877_p13 = pneg %p1861_p11 }
  0x1e   : > { %s1530_s27 = scalar_lea.hbm %s2310_s2, 64 }
  0x1f   : > { %p1531_p12 = scmp.ne.s32.totalorder %s2310_s2, %s1530_s27  ;;  %p1537_p5 = scmp.lt.u32.totalorder %s1530_s27, %s2310_s2 }
  0x21   : > { %p1533_p0 = pnand %p1877_p13, %p1531_p12 }
  0x23   : > { %p1534_p3 = pneg %p1533_p0 }
  0x25   : > { %p1539_p7 = pnand %p1537_p5, %p1534_p3 }
  0x27   : > { %1542 = shalt.err (!%p1539_p7)
}
  0x28   : > { %s1543_s23 = scalar_lea.vmem %s273_s19, 64  ;;  %p1551_p2 = scmp.lt.s32.totalorder %s273_s19, %s273_s19 }
  0x29   : > { %p1544_p10 = scmp.ne.s32.totalorder %s273_s19, %s1543_s23  ;;  %p1552_p6 = scmp.lt.s32.totalorder %s1543_s23, %s1543_s23 }
  0x2b   : > { %p1546_p9 = pnand %p1544_p10, %p1877_p13  ;;  %p1553_p4 = por %p1552_p6, %p1551_p2 }
  0x2d   : > { %p1547_p1 = pneg %p1546_p9 }
  0x2f   : > { %p1554_p8 = pnand %p1553_p4, %p1547_p1 }
  0x31   : > { %1557 = shalt.err (!%p1554_p8)
}
  0x32   : > { %1441 = dma.hbm_to_vmem [thread:$0]  (!%p1861_p11), %s2310_s2, 64, %s273_s19, [#allocation6]  }
  0x33   : > { %s2312_s3 = sld [smem:[#allocation20_spill]] }
  0x39   : > { %s1558_s29 = scalar_lea.hbm %s2312_s3, 64 }
  0x3a   : > { %p1559_p9 = scmp.ne.s32.totalorder %s2312_s3, %s1558_s29  ;;  %p1565_p1 = scmp.lt.u32.totalorder %s1558_s29, %s2312_s3 }
  0x3c   : > { %p1561_p12 = pnand %p1559_p9, %p1877_p13 }
  0x3e   : > { %p1562_p2 = pneg %p1561_p12 }
  0x40   : > { %p1567_p4 = pnand %p1565_p1, %p1562_p2 }
  0x42   : > { %1570 = shalt.err (!%p1567_p4)
}
  0x43   : > { %s1571_s19 = scalar_lea.vmem %s1865_s21, 64  ;;  %p1579_p3 = scmp.lt.s32.totalorder %s1865_s21, %s1865_s21 }
  0x44   : > { %p1572_p6 = scmp.ne.s32.totalorder %s1865_s21, %s1571_s19  ;;  %p1580_p5 = scmp.lt.s32.totalorder %s1571_s19, %s1571_s19 }
  0x46   : > { %p1574_p8 = pnand %p1572_p6, %p1877_p13  ;;  %p1581_p7 = por %p1580_p5, %p1579_p3 }
  0x48   : > { %p1575_p0 = pneg %p1574_p8 }
  0x4a   : > { %p1582_p10 = pnand %p1581_p7, %p1575_p0 }
  0x4c   : > { %1585 = shalt.err (!%p1582_p10)
}
  0x4d   : > { %1444 = dma.hbm_to_vmem [thread:$0]  (!%p1861_p11), %s2312_s3, 64, %s1865_s21, [#allocation9]  }
  0x4e   : > { %s2313_s4 = sld [smem:[#allocation21_spill]] }
  0x54   : > { %s1586_s28 = scalar_lea.hbm %s2313_s4, 64 }
  0x55   : > { %p1587_p9 = scmp.ne.s32.totalorder %s2313_s4, %s1586_s28  ;;  %p1593_p1 = scmp.lt.u32.totalorder %s1586_s28, %s2313_s4 }
  0x57   : > { %p1589_p12 = pnand %p1587_p9, %p1877_p13 }
  0x59   : > { %p1590_p2 = pneg %p1589_p12 }
  0x5b   : > { %p1595_p4 = pnand %p1593_p1, %p1590_p2 }
  0x5d   : > { %1598 = shalt.err (!%p1595_p4)
}
  0x5e   : > { %s1599_s21 = scalar_lea.vmem %s1867_s24, 64  ;;  %p1607_p3 = scmp.lt.s32.totalorder %s1867_s24, %s1867_s24 }
  0x5f   : > { %p1600_p6 = scmp.ne.s32.totalorder %s1867_s24, %s1599_s21  ;;  %p1608_p5 = scmp.lt.s32.totalorder %s1599_s21, %s1599_s21 }
  0x61   : > { %p1602_p8 = pnand %p1600_p6, %p1877_p13  ;;  %p1609_p7 = por %p1608_p5, %p1607_p3 }
  0x63   : > { %p1603_p0 = pneg %p1602_p8 }
  0x65   : > { %p1610_p10 = pnand %p1609_p7, %p1603_p0 }
  0x67   : > { %1613 = shalt.err (!%p1610_p10)
}
  0x68   : > { %1447 = dma.hbm_to_vmem [thread:$0]  (!%p1861_p11), %s2313_s4, 64, %s1867_s24, [#allocation9]  }
  0x69   : > { %s1940_s14 = sadd.s32 1, %s1752_s12   ;;  %s36_s25 = sadd.s32 1, %s1748_s11 }
  0x6a   : > { %s33_s22 = ssub.s32 %s1752_s12, %s1940_s14  ;;  %p43_p9 = scmp.ne.s32.totalorder %s1748_s11, %s1744_s10 }
  0x6b   : > { %p34_p13 = scmp.eq.s32.totalorder %s33_s22, 0  ;;  %p44_p12 = scmp.eq.s32.totalorder %s1752_s12, 0 }
  0x6c   : > { %p1462_p2 = scmp.lt.s32.totalorder %s1752_s12, 2  ;;  %p2314_p4 = scmp.eq.s32.totalorder %s1833_s13, 1 }
  0x6d   : > { %s1950_s26 = scalar_select %p34_p13, %s1748_s11, %s36_s25  }
  0x6e   : > { %p45_p1 = por %p44_p12, %p43_p9  ;;  %p1954_p6 = por %p2314_p4, %p43_p9 }
  0x6f   : > { %s1959_s28 = sand.u32 1, %s1748_s11   ;;  %s1417_s24 = sshll.u32 %s1752_s12, 7 }
  0x70   : > { %s2315_s27 = scalar_select %p1954_p6, 1, 0 }
  0x71   : > { %s1381_s29 = sshll.u32 %s1959_s28, 3  ;;  %s2316_s0 = sld [smem:[#allocation18_spill]] }
  0x72   : > { %s321_s21 = scalar_lea.vmem [#allocation2], %s1381_s29  ;;  %p1968_p11 = pnand %p1462_p2, %p45_p1 }
  0x73   : > { %s329_s19 = sshll.u32 %s321_s21, 4  ;;  %s318_s25 = scalar_lea.sflag [#allocation3], %s1959_s28  ;;  %s1972_s19 = int_to_ptr.vmem [resolvable:$true] %s329_s19 }
  0x74   : > { %p1616_p0 = pneg %p1968_p11 }
  0x77   : > { %s1966_s23 = scalar_lea.hbm %s2316_s0, %s1417_s24  ;;  %s1619_s18 = scalar_lea.hbm %s2316_s0, 256 }
  0x78   : > { %s1614_s2 = scalar_lea.hbm %s1966_s23, 128  ;;  %p1620_p7 = scmp.lt.u32.totalorder %s1966_s23, %s2316_s0 }
  0x79   : > { %p1615_p8 = scmp.ne.s32.totalorder %s1966_s23, %s1614_s2  ;;  %p1621_p10 = scmp.lt.u32.totalorder %s1619_s18, %s1614_s2 }
  0x7a   : > { %p1623_p9 = scmp.lt.u32.totalorder %s1614_s2, %s1966_s23 }
  0x7b   : > { %p1617_p3 = pnand %p1616_p0, %p1615_p8  ;;  %p1622_p13 = por %p1621_p10, %p1620_p7 }
  0x7d   : > { %p1618_p5 = pneg %p1617_p3  ;;  %p1624_p12 = por %p1623_p9, %p1622_p13 }
  0x7f   : > { %p1625_p2 = pnand %p1624_p12, %p1618_p5 }
  0x81   : > { %1628 = shalt.err (!%p1625_p2)
}
  0x82   : > { %s1629_s22 = scalar_lea.vmem %s1972_s19, 128  ;;  %s1757_s24 = smov [#allocation2]  }
  0x83   : > { %p1630_p1 = scmp.ne.s32.totalorder %s1972_s19, %s1629_s22  ;;  %s1634_s29 = sshll.u32 %s1757_s24, 4  ;;  %s1635_s29 = int_to_ptr.vmem [resolvable:$false] %s1634_s29 }
  0x84   : > { %s1636_s20 = scalar_lea.vmem %s1635_s29, 256  ;;  %p1637_p3 = scmp.lt.s32.totalorder %s1972_s19, %s1635_s29 }
  0x85   : > { %p1632_p4 = pnand %p1630_p1, %p1616_p0  ;;  %p1638_p7 = scmp.lt.s32.totalorder %s1636_s20, %s1629_s22 }
  0x87   : > { %p1633_p8 = pneg %p1632_p4  ;;  %p1639_p10 = por %p1638_p7, %p1637_p3 }
  0x89   : > { %p1640_p13 = pnand %p1639_p10, %p1633_p8 }
  0x8b   : > { %1643 = shalt.err (!%p1640_p13)
}
  0x8c   : > { %1451 = dma.hbm_to_vmem [thread:$0]  (!%p1968_p11), %s1966_s23, 128, %s1972_s19, %s318_s25  }
  0x8d   : > { %s1384_s2 = sshll.u32 %s1959_s28, 4  ;;  %s1418_s18 = sshll.u32 %s1752_s12, 8 }
  0x8e   : > { %s2006_s0 = scalar_lea.hbm %s2287_s1, %s1418_s18  ;;  %s340_s22 = scalar_lea.vmem [#allocation5], %s1384_s2 }
  0x8f   : > { %s348_s29 = sshll.u32 %s340_s22, 4  ;;  %s2318_s20 = sand.u32 1, %s1752_s12   ;;  %s349_s29 = int_to_ptr.vmem [resolvable:$true] %s348_s29 }
  0x90   : > { %s337_s3 = scalar_lea.sflag [#allocation6], %s2318_s20  ;;  %s1644_s4 = scalar_lea.hbm %s2006_s0, 256 }
  0x91   : > { %p1645_p5 = scmp.ne.s32.totalorder %s2006_s0, %s1644_s4  ;;  %s1649_s19 = scalar_lea.hbm %s2287_s1, 512 }
  0x92   : > { %p1650_p2 = scmp.lt.u32.totalorder %s2006_s0, %s2287_s1  ;;  %p1651_p1 = scmp.lt.u32.totalorder %s1649_s19, %s1644_s4 }
  0x93   : > { %p1647_p9 = pnand %p1645_p5, %p1616_p0  ;;  %p1653_p8 = scmp.lt.u32.totalorder %s1644_s4, %s2006_s0 }
  0x94   : > { %p1652_p4 = por %p1651_p1, %p1650_p2 }
  0x95   : > { %p1648_p12 = pneg %p1647_p9 }
  0x96   : > { %p1654_p3 = por %p1653_p8, %p1652_p4 }
  0x98   : > { %p1655_p7 = pnand %p1654_p3, %p1648_p12 }
  0x9a   : > { %1658 = shalt.err (!%p1655_p7)
}
  0x9b   : > { %s1659_s2 = scalar_lea.vmem %s349_s29, 256  ;;  %s1758_s21 = smov [#allocation5]  }
  0x9c   : > { %p1660_p10 = scmp.ne.s32.totalorder %s349_s29, %s1659_s2  ;;  %s1664_s24 = sshll.u32 %s1758_s21, 4  ;;  %s1665_s24 = int_to_ptr.vmem [resolvable:$false] %s1664_s24 }
  0x9d   : > { %s1666_s22 = scalar_lea.vmem %s1665_s24, 512  ;;  %p1667_p9 = scmp.lt.s32.totalorder %s349_s29, %s1665_s24 }
  0x9e   : > { %p1662_p13 = pnand %p1660_p10, %p1616_p0  ;;  %p1668_p6 = scmp.lt.s32.totalorder %s1666_s22, %s1659_s2 }
  0xa0   : > { %p1663_p5 = pneg %p1662_p13  ;;  %p1669_p1 = por %p1668_p6, %p1667_p9 }
  0xa2   : > { %p1670_p2 = pnand %p1669_p1, %p1663_p5 }
  0xa4   : > { %1673 = shalt.err (!%p1670_p2)
}
  0xa5   : > { %1454 = dma.hbm_to_vmem [thread:$0]  (!%p1968_p11), %s2006_s0, 256, %s349_s29, %s337_s3  }
  0xa6   : > { %p2319_p12 = scmp.ne.s32.totalorder %s2308_s17, 0 }
  0xa7   : > { %s2032_s4 = sand.u32 (!%p2319_p12), 1, %s1744_s10   ;;  %p2320_p6 = scmp.ne.s32.totalorder (!%p2319_p12), %s2305_s15, 0 }
  0xa8   : > { %357 = sbr.rel (%p2319_p12) target bundleno = 1341 (0x53d), region = 56  ;;  %s1388_s20 = sshll.u32 (!%p2319_p12), %s2032_s4, 3 }
  0xa9   : > { %s360_s28 = scalar_lea.sflag (!%p2319_p12), [#allocation3], %s2032_s4  ;;  %s2036_s23 = scalar_lea.vmem (!%p2319_p12), [#allocation2], %s1388_s20 }
  0xaf   : > { %1719 = dma.done.wait (%p2320_p6), %s360_s28, 128  }
  0xb0   : > { %1721 = vsyncadd (%p2320_p6), %s360_s28, 4294967168  ;;  %s368_s0 = sand.u32 1, %s1833_s13   ;;  %s1389_s3 = sshll.u32 %s2032_s4, 4 }
  0xb1   : > { %s369_s17 = scalar_lea.sflag [#allocation6], %s368_s0  ;;  %s372_s16 = scalar_lea.vmem [#allocation5], %s1389_s3 }
  0xb2   : > { %1723 = dma.done.wait (%p2320_p6), %s369_s17, 256  }
  0xb3   : > { %1725 = vsyncadd (%p2320_p6), %s369_s17, 4294967040  ;;  %p2321_p11 = scmp.eq.s32.totalorder %s1833_s13, 0 }
  0xb5   : > { %1727 = dma.done.wait (%p2321_p11), [#allocation6], 64   ;;  %p2322_p0 = pmov %p2321_p11 }
  0xb7   : > { %1729 = vsyncadd (%p2322_p0), [#allocation6], 4294967232  ;;  %p2323_p4 = pmov %p2322_p0 }
  0xb8   : > { %p2324_p8 = pmov %p2322_p0 }
  0xb9   : > { %1731 = dma.done.wait (%p2323_p4), [#allocation9], 128  }
  0xba   : > { %1733 = vsyncadd (%p2324_p8), [#allocation9], 4294967168  ;;  %v1759_v0 = vmov 0.0   ;;  %v427_v1 = vld [vmem:[%s372_s16] sm:$0xff]  ;;  %v428_v2 = vld [vmem:[%s372_s16 + $0x8] sm:$0xff]  ;;  %vm437_vm0 = vcmask 64512  }
  0xbb   : > { %505 = vmatprep.mubr.f32.mxu0 %v1759_v0  ;;  %576 = vmatprep.mubr.f32.mxu1 %v1759_v0  ;;  %v430_v3 = vunpack.c.h.bf16 %v427_v1  ;;  %v429_v4 = vunpack.c.l.bf16 %v427_v1  ;;  %v432_v5 = vunpack.c.h.bf16 %v428_v2  ;;  %v431_v6 = vunpack.c.l.bf16 %v428_v2  ;;  %v436_v7 = vld [vmem:[#allocation8] sm:$0xf]  ;;  %v424_v8 = vld [vmem:[%s2036_s23] sm:$0xff]  ;;  %v712_v13 = vld [vmem:[#allocation7] sm:$0xf]  ;;  %s1419_s22 = sshll.u32 %s1833_s13, 8 }
  0xbc   : > { %v2059_v9 = vunpack.c.l.bf16 %v424_v8  ;;  %v2061_v10 = vunpack.c.h.bf16 %v424_v8  ;;  %vm721_vm1 = vcmask 1043456   ;;  %vm717_vm2 = vcmask 31744   ;;  %s423_s20 = scalar_lea.vmem [#allocation11], %s1389_s3  ;;  %s2242_s17 = scalar_lea.hbm %s2295_s9, %s1419_s22 }
  0xbd   : > { %441 = vmatprep.subr.mxu0 %v430_v3  ;;  %512 = vmatprep.subr.mxu1 %v432_v5  ;;  %vm585_vm3 = vcmask 1041408   ;;  %vm639_vm4 = vcmask 1043458   ;;  %v1760_v50 = vmov 0   ;;  %s1254_s28 = sshll.u32 %s423_s20, 4  ;;  %s1240_s13 = scalar_lea.sflag [#allocation4], %s2032_s4  ;;  %s2244_s28 = int_to_ptr.vmem [resolvable:$true] %s1254_s28 }
  0xbe   : > { %442 = vmatpush1.msra.mxu0 %v429_v4  ;;  %513 = vmatpush1.msra.mxu1 %v431_v6  ;;  %v715_v11 = vcombine.high %v2059_v9, %v2059_v9  ;;  %v716_v12 = vcombine.high %v2061_v10, %v2061_v10  ;;  %s1674_s3 = scalar_lea.vmem %s2244_s28, 256  ;;  %p2327_p7 = scmp.ne.s32.totalorder %s2315_s27, 0 }
  0xbf   : > { %1394 = vmatmul.mubr.msk.f32.vlgmr.msra.gmra.mrb[0].mxu0 %vm437_vm0, %v436_v7  ;;  %1395 = vmatmul.mubr.msk.f32.vlgmr.msra.gmra.mrb[0].mxu1 %vm437_vm0, %v436_v7  ;;  %p1675_p3 = scmp.ne.s32.totalorder %s2244_s28, %s1674_s3  ;;  %s1761_s16 = smov [#allocation11]  }
  0xc0   : > { %794 = vmatprep.mubr.f32.mxu0 %v1759_v0  ;;  %865 = vmatprep.mubr.f32.mxu1 %v1759_v0  ;;  %s1678_s15 = sshll.u32 %s1761_s16, 4  ;;  %s1679_s15 = int_to_ptr.vmem [resolvable:$false] %s1678_s15 }
  0xc1   : > { %1396 = vmatprep.subr.msk.mxu0 %vm721_vm1, %v715_v11  ;;  %1399 = vmatprep.subr.msk.mxu1 %vm721_vm1, %v716_v12  ;;  %p1676_p10 = pnand %p1675_p3, %p2327_p7  ;;  %s1680_s29 = scalar_lea.vmem %s1679_s15, 512 }
  0xc2   : > { %1397 = vmatpush1.msk.msra.mxu0 %vm721_vm1, %v2059_v9  ;;  %1400 = vmatpush1.msk.msra.mxu1 %vm721_vm1, %v2061_v10  ;;  %p1681_p5 = scmp.lt.s32.totalorder %s2244_s28, %s1679_s15  ;;  %p1682_p9 = scmp.lt.s32.totalorder %s1680_s29, %s1674_s3 }
  0xc3   : > { %1398 = vmatmul.mubr.msk.f32.vlgmr.msra.gmra.mrb[2].mxu0 %vm717_vm2, %v712_v13  ;;  %1401 = vmatmul.mubr.msk.f32.vlgmr.msra.gmra.mrb[2].mxu1 %vm717_vm2, %v712_v13  ;;  %p1677_p13 = pneg %p1676_p10 }
  0xc4   : > { %1033 = vmatprep.mubr.f32.mxu0 %v1759_v0  ;;  %1104 = vmatprep.mubr.f32.mxu1 %v1759_v0  ;;  %p1683_p1 = por %p1682_p9, %p1681_p5 }
  0xc5   : > { %1504 = vset.pattern.permute.xlu0 %v1760_v50  ;;  %1505 = vset.pattern.permute.xlu1 %v1760_v50 }
  0xc6   : > { %p1684_p2 = pnand %p1683_p1, %p1677_p13 }
 0x192   : > { %v2075_v14 = vpop.f32.mrb[0].mxu0  ;;  %v2077_v15 = vpop.f32.mrb[0].mxu1 }
 0x193   : > { %v586_v16 = vsel %vm585_vm3, %v2075_v14, 0.0  ;;  %v602_v17 = vmul.f32 %v2075_v14, %v2075_v14  ;;  %v2083_v18 = vpop.f32.mrb[1].mxu0  ;;  %v2085_v19 = vpop.f32.mrb[1].mxu1  ;;  %v640_v20 = vsel %vm639_vm4, %v2075_v14, 0.0  ;;  %v643_v24 = vsel %vm639_vm4, %v2077_v15, 0.0 }
 0x194   : > { %v587_v21 = vsel %vm585_vm3, %v2083_v18, 0.0  ;;  %v603_v22 = vmul.f32 %v2083_v18, %v2083_v18  ;;  %v641_v23 = vsel %vm639_vm4, %v2083_v18, 0.0  ;;  %v604_v26 = vmul.f32 %v2077_v15, %v2077_v15 }
 0x195   : > { %v642_v25 = vadd.f32 %v641_v23, %v640_v20  ;;  %v659_v27 = vsel %vm639_vm4, %v602_v17, 0.0  ;;  %v605_v28 = vmul.f32 %v2085_v19, %v2085_v19  ;;  %v588_v30 = vadd.f32 %v587_v21, %v586_v16 }
 0x196   : > { %v660_v29 = vsel %vm639_vm4, %v603_v22, 0.0  ;;  %v589_v31 = vsel %vm585_vm3, %v2077_v15, 0.0  ;;  %v645_v33 = vsel %vm639_vm4, %v2085_v19, 0.0  ;;  %v662_v35 = vsel %vm639_vm4, %v604_v26, 0.0 }
 0x197   : > { %v644_v32 = vadd.f32 %v643_v24, %v642_v25  ;;  %v661_v34 = vadd.f32 %v660_v29, %v659_v27  ;;  %v590_v36 = vadd.f32 %v589_v31, %v588_v30  ;;  %v606_v37 = vsel %vm585_vm3, %v602_v17, 0.0 }
 0x198   : > { %v607_v38 = vsel %vm585_vm3, %v603_v22, 0.0  ;;  %v609_v39 = vsel %vm585_vm3, %v604_v26, 0.0  ;;  %v591_v42 = vsel %vm585_vm3, %v2085_v19, 0.0  ;;  %v664_v44 = vsel %vm639_vm4, %v605_v28, 0.0 }
 0x199   : > { %v646_v40 = vadd.f32 %v645_v33, %v644_v32  ;;  %v663_v41 = vadd.f32 %v662_v35, %v661_v34  ;;  %v608_v43 = vadd.f32 %v607_v38, %v606_v37  ;;  %v592_v45 = vadd.f32 %v591_v42, %v590_v36  ;;  %v2126_v42 = vld [vmem:[%s2293_s7] sm:$0xf] }
 0x19a   : > { %v611_v48 = vsel %vm585_vm3, %v605_v28, 0.0 }
 0x19b   : > { %647 = vadd.xlane.f32.xlu0 %v646_v40  ;;  %v665_v46 = vadd.f32 %v664_v44, %v663_v41  ;;  %v610_v47 = vadd.f32 %v609_v39, %v608_v43  ;;  %v583_v39 = vlaneseq }
 0x19d   : > { %666 = vadd.xlane.f32.xlu1 %v665_v46  ;;  %v612_v49 = vadd.f32 %v611_v48, %v610_v47  ;;  %v2119_v40 = vshrl.u32 %v583_v39, 7 }
 0x19f   : > { %593 = vadd.xlane.f32.xlu0 %v592_v45  ;;  %vm685_vm5 = vcmp.ge.s32.totalorder %v2119_v40, 2  ;;  %vm686_vm6 = vcmp.lt.s32.totalorder %v2119_v40, 4  ;;  %vm631_vm7 = vcmp.lt.s32.totalorder %v2119_v40, 2 }
 0x1a0   : > { %vm2130_vm8 = vmand %vm685_vm5, %vm686_vm6 }
 0x1a1   : > { %613 = vadd.xlane.f32.xlu1 %v612_v49 }
 0x228   : > { %v648_v51 = vpop.xlane.xlu0 %647 }
 0x229   : > { %v650_v52 = vrot.slane %v648_v51, 2  ;;  %v2141_v51 = vld [vmem:[%s2294_s8] sm:$0xf] }
 0x22a   : > { %v667_v53 = vpop.xlane.xlu1 %666 }
 0x22b   : > { %v652_v54 = vsel %vm585_vm3, %v650_v52, 0.0  ;;  %v669_v55 = vrot.slane %v667_v53, 2 }
 0x22c   : > { %v653_v56 = vrot.slane %v652_v54, 4  ;;  %v594_v57 = vpop.xlane.xlu0 %593 }
 0x22d   : > { %v671_v58 = vsel %vm585_vm3, %v669_v55, 0.0  ;;  %v595_v59 = vsel %vm585_vm3, %v594_v57, 0.0 }
 0x22e   : > { %v654_v60 = vadd.f32 %v653_v56, %v652_v54  ;;  %v672_v61 = vrot.slane %v671_v58, 4  ;;  %v596_v62 = vrot.slane %v595_v59, 4  ;;  %v614_v63 = vpop.xlane.xlu1 %613 }
 0x22f   : > { %v615_v0 = vsel %vm585_vm3, %v614_v63, 0.0  ;;  %v435_v63 = vld [vmem:[%s2292_s6] sm:$0xf] }
 0x230   : > { %v655_v1 = vrot.slane %v654_v60, 2  ;;  %v673_v2 = vadd.f32 %v672_v61, %v671_v58  ;;  %v597_v3 = vadd.f32 %v596_v62, %v595_v59  ;;  %v616_v4 = vrot.slane %v615_v0, 4  ;;  %v796_v58 = vpop.f32.mrb[2].mxu0  ;;  %v876_v59 = vld [vmem:[#allocation10] sm:$0xf]  ;;  %v867_v61 = vpop.f32.mrb[2].mxu1 }
 0x231   : > { %v869_v62 = vpop.f32.mrb[3].mxu1 }
 0x232   : > { %v656_v5 = vadd.f32 %v655_v1, %v654_v60  ;;  %v674_v6 = vrot.slane %v673_v2, 2  ;;  %v598_v7 = vrot.slane %v597_v3, 2  ;;  %v617_v8 = vadd.f32 %v616_v4, %v615_v0  ;;  %v798_v60 = vpop.f32.mrb[3].mxu0 }
 0x234   : > { %v657_v11 = vrot.slane %v656_v5, 1  ;;  %v675_v12 = vadd.f32 %v674_v6, %v673_v2  ;;  %v599_v13 = vadd.f32 %v598_v7, %v597_v3  ;;  %v618_v16 = vrot.slane %v617_v8, 2 }
 0x236   : > { %v658_v17 = vadd.f32 %v657_v11, %v656_v5  ;;  %v676_v20 = vrot.slane %v675_v12, 1  ;;  %v600_v21 = vrot.slane %v599_v13, 1  ;;  %v619_v22 = vadd.f32 %v618_v16, %v617_v8 }
 0x238   : > { %v678_v23 = vmul.f32 0.0009765625, %v658_v17  ;;  %v677_v24 = vadd.f32 %v676_v20, %v675_v12  ;;  %v601_v25 = vadd.f32 %v600_v21, %v599_v13  ;;  %v620_v26 = vrot.slane %v619_v22, 1 }
 0x23a   : > { %v680_v27 = vmul.f32 %v678_v23, %v678_v23  ;;  %v679_v28 = vmul.f32 0.0009765625, %v677_v24  ;;  %v623_v29 = vmul.f32 0.0009765625, %v601_v25  ;;  %v621_v30 = vadd.f32 %v620_v26, %v619_v22 }
 0x23c   : > { %v681_v31 = vsub.f32 %v679_v28, %v680_v27  ;;  %v625_v32 = vmul.f32 %v623_v29, %v623_v29  ;;  %v624_v33 = vmul.f32 0.0009765625, %v621_v30 }
 0x23e   : > { %v682_v34 = vmax.f32 %v681_v31, 0.0  ;;  %v626_v35 = vsub.f32 %v624_v33, %v625_v32 }
 0x240   : > { %v683_v36 = vadd.f32 1e-05, %v682_v34  ;;  %v627_v37 = vmax.f32 %v626_v35, 0.0 }
 0x242   : > { %1506 = vrsqrt.f32 %v683_v36  ;;  %v628_v38 = vadd.f32 1e-05, %v627_v37 }
 0x244   : > { %1508 = vrsqrt.f32 %v628_v38 }
 0x24c   : > { %v1507_v41 = vpop.eup %1506 }
 0x24d   : > { %v690_v43 = vmul.f32 %v1507_v41, %v678_v23  ;;  %v688_v48 = vmul.f32 %v1507_v41, %v2126_v42 }
 0x24e   : > { %v1509_v44 = vpop.eup %1508 }
 0x24f   : > { %v633_v45 = vmul.f32 %v1509_v44, %v2126_v42  ;;  %v635_v47 = vmul.f32 %v1509_v44, %v623_v29  ;;  %v691_v49 = vmul.f32 %v690_v43, %v2126_v42 }
 0x251   : > { %v634_v50 = vsel %vm631_vm7, %v633_v45, 0.0  ;;  %v636_v52 = vmul.f32 %v635_v47, %v2126_v42  ;;  %v692_v55 = vsub.f32 %v2141_v51, %v691_v49 }
 0x252   : > { %v689_v53 = vsel %vm2130_vm8, %v688_v48, %v634_v50 }
 0x253   : > { %696 = vperm.xlu0 %1504, %v689_v53   ;;  %v637_v54 = vsub.f32 %v2141_v51, %v636_v52 }
 0x255   : > { %v638_v56 = vsel %vm631_vm7, %v637_v54, 0.0 }
 0x256   : > { %v693_v57 = vsel %vm2130_vm8, %v692_v55, %v638_v56 }
 0x257   : > { %705 = vperm.xlu1 %1505, %v693_v57  }
 0x25b   : > { %879 = vperm.xlu1 %1505, %v876_v59  }
 0x25f   : > { %951 = vperm.xlu1 %1505, %v435_v63  }
 0x2d2   : > { %v697_v0 = vpop.permute.xlu0 %696 }
 0x2d3   : > { %v699_v1 = vmul.f32 %v697_v0, %v2075_v14  ;;  %v700_v2 = vmul.f32 %v697_v0, %v2083_v18  ;;  %v701_v3 = vmul.f32 %v697_v0, %v2077_v15  ;;  %v702_v4 = vmul.f32 %v697_v0, %v2085_v19 }
 0x2d6   : > { %v706_v5 = vpop.permute.xlu1 %705 }
 0x2d7   : > { %v708_v6 = vadd.f32 %v706_v5, %v699_v1  ;;  %v709_v7 = vadd.f32 %v706_v5, %v700_v2  ;;  %v710_v8 = vadd.f32 %v706_v5, %v701_v3  ;;  %v711_v11 = vadd.f32 %v706_v5, %v702_v4 }
 0x2d9   : > { %v797_v12 = vadd.f32 %v796_v58, %v708_v6  ;;  %v799_v13 = vadd.f32 %v798_v60, %v709_v7  ;;  %v868_v16 = vadd.f32 %v867_v61, %v710_v8  ;;  %v870_v17 = vadd.f32 %v869_v62, %v711_v11 }
 0x2da   : > { %v880_v14 = vpop.permute.xlu1 %879 }
 0x2db   : > { %v872_v20 = vmax.f32 %v797_v12, 0.0  ;;  %v873_v21 = vmax.f32 %v799_v13, 0.0  ;;  %v874_v22 = vmax.f32 %v868_v16, 0.0  ;;  %v875_v23 = vmax.f32 %v870_v17, 0.0 }
 0x2dd   : > { %v882_v24 = vmul.f32 %v880_v14, %v872_v20  ;;  %v883_v18 = vmul.f32 %v880_v14, %v873_v21  ;;  %v884_v25 = vmul.f32 %v880_v14, %v874_v22  ;;  %v885_v15 = vmul.f32 %v880_v14, %v875_v23  ;;  %v948_v20 = vld [vmem:[%s2291_s5] sm:$0xf] }
 0x2df   : > { %v886_v19 = vsel %vm721_vm1, %v882_v24, 0.0  ;;  %v893_v26 = vsel %vm721_vm1, %v883_v18, 0.0  ;;  %v900_v27 = vsel %vm721_vm1, %v884_v25, 0.0  ;;  %v907_v28 = vsel %vm721_vm1, %v885_v15, 0.0 }
 0x2e0   : > { %v887_v29 = vrot.slane %v886_v19, 4  ;;  %v894_v30 = vrot.slane %v893_v26, 4  ;;  %v901_v31 = vrot.slane %v900_v27, 4  ;;  %v908_v32 = vrot.slane %v907_v28, 4 }
 0x2e2   : > { %v888_v33 = vadd.f32 %v887_v29, %v886_v19  ;;  %v895_v34 = vadd.f32 %v894_v30, %v893_v26  ;;  %v902_v35 = vadd.f32 %v901_v31, %v900_v27  ;;  %v909_v36 = vadd.f32 %v908_v32, %v907_v28 }
 0x2e4   : > { %v889_v37 = vrot.slane %v888_v33, 2  ;;  %v896_v38 = vrot.slane %v895_v34, 2  ;;  %v903_v39 = vrot.slane %v902_v35, 2  ;;  %v910_v41 = vrot.slane %v909_v36, 2 }
 0x2e6   : > { %v890_v43 = vadd.f32 %v889_v37, %v888_v33  ;;  %v897_v44 = vadd.f32 %v896_v38, %v895_v34  ;;  %v904_v45 = vadd.f32 %v903_v39, %v902_v35  ;;  %v911_v47 = vadd.f32 %v910_v41, %v909_v36 }
 0x2e8   : > { %v891_v48 = vrot.slane %v890_v43, 1  ;;  %v898_v49 = vrot.slane %v897_v44, 1  ;;  %v905_v50 = vrot.slane %v904_v45, 1  ;;  %v912_v52 = vrot.slane %v911_v47, 1 }
 0x2ea   : > { %v892_v53 = vadd.f32 %v891_v48, %v890_v43  ;;  %v899_v54 = vadd.f32 %v898_v49, %v897_v44  ;;  %v906_v55 = vadd.f32 %v905_v50, %v904_v45  ;;  %v913_v56 = vadd.f32 %v912_v52, %v911_v47 }
 0x2ec   : > { %v1402_v57 = vmul.f32 -1.442695, %v892_v53  ;;  %v1403_v58 = vmul.f32 -1.442695, %v899_v54  ;;  %v1404_v59 = vmul.f32 -1.442695, %v906_v55 }
 0x2ed   : > { %v1405_v60 = vmul.f32 -1.442695, %v913_v56 }
 0x2ee   : > { %1510 = vpow2.f32 %v1402_v57 }
 0x2ef   : > { %1512 = vpow2.f32 %v1403_v58 }
 0x2f0   : > { %1514 = vpow2.f32 %v1404_v59 }
 0x2f1   : > { %1516 = vpow2.f32 %v1405_v60 }
 0x2f8   : > { %v1511_v61 = vpop.eup %1510 }
 0x2f9   : > { %v1513_v62 = vpop.eup %1512  ;;  %v926_v63 = vadd.f32 1.0, %v1511_v61 }
 0x2fa   : > { %v1515_v0 = vpop.eup %1514  ;;  %v927_v1 = vadd.f32 1.0, %v1513_v62 }
 0x2fb   : > { %v1517_v2 = vpop.eup %1516  ;;  %v928_v3 = vadd.f32 1.0, %v1515_v0  ;;  %1518 = vrcp.f32 %v926_v63 }
 0x2fc   : > { %v929_v4 = vadd.f32 1.0, %v1517_v2  ;;  %1520 = vrcp.f32 %v927_v1 }
 0x2fd   : > { %1522 = vrcp.f32 %v928_v3 }
 0x2fe   : > { %1524 = vrcp.f32 %v929_v4 }
 0x305   : > { %v1519_v5 = vpop.eup %1518 }
 0x306   : > { %v1521_v6 = vpop.eup %1520 }
 0x307   : > { %v1523_v7 = vpop.eup %1522  ;;  %v942_v8 = vcombine.low %v1519_v5, %v1521_v6 }
 0x308   : > { %v1525_v11 = vpop.eup %1524 }
 0x309   : > { %v946_v12 = vmul.f32 %v942_v8, %v2059_v9  ;;  %v943_v13 = vcombine.low %v1523_v7, %v1525_v11  ;;  %v952_v9 = vpop.permute.xlu1 %951 }
 0x30b   : > { %v956_v16 = vcombine.high %v946_v12, %v946_v12  ;;  %v947_v17 = vmul.f32 %v943_v13, %v2061_v10 }
 0x30d   : > { %1406 = vmatprep.subr.msk.mxu0 %vm721_vm1, %v956_v16  ;;  %v957_v21 = vcombine.high %v947_v17, %v947_v17 }
 0x30e   : > { %1407 = vmatpush1.msk.msra.mxu0 %vm721_vm1, %v946_v12 }
 0x30f   : > { %1409 = vmatprep.subr.msk.mxu1 %vm721_vm1, %v957_v21  ;;  %1408 = vmatmul.mubr.msk.f32.vlgmr.msra.gmra.mrb[4].mxu0 %vm717_vm2, %v948_v20 }
 0x310   : > { %1410 = vmatpush1.msk.msra.mxu1 %vm721_vm1, %v947_v17 }
 0x311   : > { %1411 = vmatmul.mubr.msk.f32.vlgmr.msra.gmra.mrb[4].mxu1 %vm717_vm2, %v948_v20 }
 0x3e2   : > { %v1035_v22 = vpop.f32.mrb[4].mxu0 }
 0x3e3   : > { %v2174_v10 = vadd.f32 %v1035_v22, %v952_v9  ;;  %v1037_v23 = vpop.f32.mrb[5].mxu0 }
 0x3e4   : > { %v1106_v14 = vpop.f32.mrb[4].mxu1  ;;  %v2176_v24 = vadd.f32 %v1037_v23, %v952_v9 }
 0x3e5   : > { %v2178_v18 = vadd.f32 %v1106_v14, %v952_v9  ;;  %v1108_v25 = vpop.f32.mrb[5].mxu1  ;;  %v1160_v15 = vsel %vm639_vm4, %v2174_v10, 0.0  ;;  %v1111_v19 = vsel %vm585_vm3, %v2174_v10, 0.0  ;;  %v1127_v26 = vmul.f32 %v2174_v10, %v2174_v10 }
 0x3e6   : > { %v2186_v27 = vadd.f32 %v1108_v25, %v952_v9  ;;  %v1161_v28 = vsel %vm639_vm4, %v2176_v24, 0.0  ;;  %v1112_v29 = vsel %vm585_vm3, %v2176_v24, 0.0  ;;  %v1128_v30 = vmul.f32 %v2176_v24, %v2176_v24 }
 0x3e7   : > { %v1162_v31 = vadd.f32 %v1161_v28, %v1160_v15  ;;  %v1113_v32 = vadd.f32 %v1112_v29, %v1111_v19  ;;  %v1163_v33 = vsel %vm639_vm4, %v2178_v18, 0.0  ;;  %v1114_v35 = vsel %vm585_vm3, %v2178_v18, 0.0 }
 0x3e8   : > { %v1165_v34 = vsel %vm639_vm4, %v2186_v27, 0.0  ;;  %v1129_v36 = vmul.f32 %v2178_v18, %v2178_v18  ;;  %v1179_v39 = vsel %vm639_vm4, %v1127_v26, 0.0  ;;  %v1180_v41 = vsel %vm639_vm4, %v1128_v30, 0.0 }
 0x3e9   : > { %v1164_v37 = vadd.f32 %v1163_v33, %v1162_v31  ;;  %v1115_v38 = vadd.f32 %v1114_v35, %v1113_v32  ;;  %v1116_v43 = vsel %vm585_vm3, %v2186_v27, 0.0  ;;  %v1130_v44 = vmul.f32 %v2186_v27, %v2186_v27 }
 0x3ea   : > { %v1181_v45 = vadd.f32 %v1180_v41, %v1179_v39  ;;  %v1131_v47 = vsel %vm585_vm3, %v1127_v26, 0.0  ;;  %v1182_v50 = vsel %vm639_vm4, %v1129_v36, 0.0  ;;  %v1132_v52 = vsel %vm585_vm3, %v1128_v30, 0.0 }
 0x3eb   : > { %v1166_v48 = vadd.f32 %v1165_v34, %v1164_v37  ;;  %v1117_v49 = vadd.f32 %v1116_v43, %v1115_v38  ;;  %v1133_v54 = vadd.f32 %v1132_v52, %v1131_v47  ;;  %v1184_v55 = vsel %vm639_vm4, %v1130_v44, 0.0 }
 0x3ec   : > { %v1183_v53 = vadd.f32 %v1182_v50, %v1181_v45  ;;  %v1134_v56 = vsel %vm585_vm3, %v1129_v36, 0.0  ;;  %v1136_v59 = vsel %vm585_vm3, %v1130_v44, 0.0 }
 0x3ed   : > { %1167 = vadd.xlane.f32.xlu1 %v1166_v48  ;;  %1118 = vadd.xlane.f32.xlu0 %v1117_v49  ;;  %v1135_v58 = vadd.f32 %v1134_v56, %v1133_v54 }
 0x3ee   : > { %v1185_v57 = vadd.f32 %v1184_v55, %v1183_v53 }
 0x3ef   : > { %v1137_v60 = vadd.f32 %v1136_v59, %v1135_v58 }
 0x3f1   : > { %1186 = vadd.xlane.f32.xlu1 %v1185_v57 }
 0x3f5   : > { %1138 = vadd.xlane.f32.xlu1 %v1137_v60 }
 0x47a   : > { %v1168_v61 = vpop.xlane.xlu1 %1167  ;;  %v1119_v62 = vpop.xlane.xlu0 %1118 }
 0x47b   : > { %v1170_v63 = vrot.slane %v1168_v61, 2  ;;  %v1120_v0 = vsel %vm585_vm3, %v1119_v62, 0.0 }
 0x47c   : > { %v1121_v1 = vrot.slane %v1120_v0, 4 }
 0x47d   : > { %v1172_v2 = vsel %vm585_vm3, %v1170_v63, 0.0 }
 0x47e   : > { %v1173_v3 = vrot.slane %v1172_v2, 4  ;;  %v1122_v4 = vadd.f32 %v1121_v1, %v1120_v0  ;;  %v1187_v5 = vpop.xlane.xlu1 %1186 }
 0x47f   : > { %v1189_v6 = vrot.slane %v1187_v5, 2 }
 0x480   : > { %v1174_v7 = vadd.f32 %v1173_v3, %v1172_v2  ;;  %v1123_v8 = vrot.slane %v1122_v4, 2 }
 0x481   : > { %v1191_v11 = vsel %vm585_vm3, %v1189_v6, 0.0 }
 0x482   : > { %v1175_v12 = vrot.slane %v1174_v7, 2  ;;  %v1124_v13 = vadd.f32 %v1123_v8, %v1122_v4  ;;  %v1192_v16 = vrot.slane %v1191_v11, 4  ;;  %v1139_v17 = vpop.xlane.xlu1 %1138 }
 0x483   : > { %v1140_v20 = vsel %vm585_vm3, %v1139_v17, 0.0 }
 0x484   : > { %v1176_v21 = vadd.f32 %v1175_v12, %v1174_v7  ;;  %v1125_v9 = vrot.slane %v1124_v13, 1  ;;  %v1193_v22 = vadd.f32 %v1192_v16, %v1191_v11  ;;  %v1141_v23 = vrot.slane %v1140_v20, 4 }
 0x486   : > { %v1177_v14 = vrot.slane %v1176_v21, 1  ;;  %v1194_v25 = vrot.slane %v1193_v22, 2  ;;  %v1142_v15 = vadd.f32 %v1141_v23, %v1140_v20  ;;  %v1126_v26 = vadd.f32 %v1125_v9, %v1124_v13 }
 0x488   : > { %v1178_v19 = vadd.f32 %v1177_v14, %v1176_v21  ;;  %v1195_v28 = vadd.f32 %v1194_v25, %v1193_v22  ;;  %v1143_v29 = vrot.slane %v1142_v15, 2  ;;  %v1147_v33 = vmul.f32 0.0009765625, %v1126_v26 }
 0x48a   : > { %v1198_v30 = vmul.f32 0.0009765625, %v1178_v19  ;;  %v1196_v31 = vrot.slane %v1195_v28, 1  ;;  %v1144_v32 = vadd.f32 %v1143_v29, %v1142_v15  ;;  %v1149_v39 = vmul.f32 %v1147_v33, %v1147_v33 }
 0x48c   : > { %v1197_v34 = vadd.f32 %v1196_v31, %v1195_v28  ;;  %v1145_v35 = vrot.slane %v1144_v32, 1  ;;  %v1200_v36 = vmul.f32 %v1198_v30, %v1198_v30 }
 0x48e   : > { %v1199_v37 = vmul.f32 0.0009765625, %v1197_v34  ;;  %v1146_v38 = vadd.f32 %v1145_v35, %v1144_v32 }
 0x490   : > { %v1201_v41 = vsub.f32 %v1199_v37, %v1200_v36  ;;  %v1148_v43 = vmul.f32 0.0009765625, %v1146_v38 }
 0x492   : > { %v1202_v44 = vmax.f32 %v1201_v41, 0.0  ;;  %v1150_v45 = vsub.f32 %v1148_v43, %v1149_v39 }
 0x494   : > { %v1203_v47 = vadd.f32 1e-05, %v1202_v44  ;;  %v1151_v48 = vmax.f32 %v1150_v45, 0.0 }
 0x496   : > { %1526 = vrsqrt.f32 %v1203_v47  ;;  %v1152_v49 = vadd.f32 1e-05, %v1151_v48 }
 0x498   : > { %1528 = vrsqrt.f32 %v1152_v49 }
 0x4a0   : > { %v1527_v50 = vpop.eup %1526 }
 0x4a1   : > { %v1207_v52 = vmul.f32 %v1527_v50, %v1198_v30  ;;  %v1205_v56 = vmul.f32 %v1527_v50, %v2126_v42 }
 0x4a2   : > { %v1529_v53 = vpop.eup %1528 }
 0x4a3   : > { %v1154_v54 = vmul.f32 %v1529_v53, %v2126_v42  ;;  %v1156_v55 = vmul.f32 %v1529_v53, %v1147_v33  ;;  %v1208_v57 = vmul.f32 %v1207_v52, %v2126_v42 }
 0x4a5   : > { %v1155_v58 = vsel %vm631_vm7, %v1154_v54, 0.0  ;;  %v1157_v59 = vmul.f32 %v1156_v55, %v2126_v42  ;;  %v1209_v62 = vsub.f32 %v2141_v51, %v1208_v57 }
 0x4a6   : > { %v1206_v60 = vsel %vm2130_vm8, %v1205_v56, %v1155_v58 }
 0x4a7   : > { %1213 = vperm.xlu1 %1505, %v1206_v60   ;;  %v1158_v61 = vsub.f32 %v2141_v51, %v1157_v59 }
 0x4a9   : > { %v1159_v63 = vsel %vm631_vm7, %v1158_v61, 0.0 }
 0x4aa   : > { %v1210_v0 = vsel %vm2130_vm8, %v1209_v62, %v1159_v63 }
 0x4ab   : > { %1222 = vperm.xlu0 %1504, %v1210_v0  }
 0x526   : > { %v1214_v1 = vpop.permute.xlu1 %1213 }
 0x527   : > { %v1216_v2 = vmul.f32 %v1214_v1, %v2174_v10  ;;  %v1217_v42 = vmul.f32 %v1214_v1, %v2176_v24  ;;  %v1218_v3 = vmul.f32 %v1214_v1, %v2178_v18  ;;  %v1219_v4 = vmul.f32 %v1214_v1, %v2186_v27 }
 0x52a   : > { %v1223_v5 = vpop.permute.xlu0 %1222 }
 0x52b   : > { %v1225_v40 = vadd.f32 %v1223_v5, %v1216_v2  ;;  %v1226_v46 = vadd.f32 %v1223_v5, %v1217_v42  ;;  %v1227_v51 = vadd.f32 %v1223_v5, %v1218_v3  ;;  %v1228_v6 = vadd.f32 %v1223_v5, %v1219_v4 }
 0x52d   : > { %v1233_v7 = vcombine.low %v1225_v40, %v1226_v46  ;;  %v1234_v8 = vcombine.low %v1227_v51, %v1228_v6 }
 0x52f   : > { %1237 = vst [vmem:[%s423_s20] sm:$0xff] %v1233_v7  ;;  %1238 = vst [vmem:[%s423_s20 + $0x8] sm:$0xff] %v1234_v8 }
 0x530   : > { %1687 = shalt.err (!%p1684_p2)
}
 0x531   : > { %s1688_s4 = scalar_lea.hbm %s2242_s17, 256  ;;  %s1692_s18 = scalar_lea.hbm %s2295_s9, 512 }
 0x532   : > { %p1689_p12 = scmp.ne.s32.totalorder %s2242_s17, %s1688_s4  ;;  %p1693_p0 = scmp.lt.u32.totalorder %s2242_s17, %s2295_s9 }
 0x533   : > { %p1694_p4 = scmp.lt.u32.totalorder %s1692_s18, %s1688_s4  ;;  %p1696_p3 = scmp.lt.u32.totalorder %s1688_s4, %s2242_s17 }
 0x534   : > { %p1690_p6 = pnand %p1689_p12, %p2327_p7 }
 0x535   : > { %p1695_p8 = por %p1694_p4, %p1693_p0 }
 0x536   : > { %p1691_p11 = pneg %p1690_p6 }
 0x537   : > { %p1697_p10 = por %p1696_p3, %p1695_p8 }
 0x539   : > { %p1698_p13 = pnand %p1697_p10, %p1691_p11 }
 0x53b   : > { %1701 = shalt.err (!%p1698_p13)
}
 0x53c   : > { %1436 = dma.vmem_to_hbm [thread:$0]  (%p2327_p7), %s2244_s28, 256, %s2242_s17, %s1240_s13  }
 0x53d PF: > { %s2328_s24 = sld [smem:[#allocation17_spill]]  ;;  %s1266_s22 = sand.u32 1, %s1740_s30  }
 0x53e   : > { %p2330_p9 = scmp.ge.s32.totalorder %s1752_s12, 2  ;;  %s1267_s20 = scalar_lea.sflag [#allocation4], %s1266_s22 }
 0x543   : > { %p2329_p5 = scmp.ne.s32.totalorder %s2328_s24, 0 }
 0x545   : > { %p1456_p1 = pnand %p2330_p9, %p2329_p5 }
 0x547   : > { %1735 = dma.done.wait (!%p1456_p1), %s1267_s20, 256  }
 0x548   : > { %1737 = vsyncadd (!%p1456_p1), %s1267_s20, 4294967040  ;;  %p26_p2 = scmp.ge.s32.totalorder %s1940_s14, 4   ;;  %s2331_s30 = smov %s1744_s10 }
 0x549   : > { %s2332_s10 = smov %s1748_s11  ;;  %s2333_s11 = smov %s1950_s26 }
 0x54a   : > { %s2334_s12 = smov %s1940_s14  ;;  %28 = sbr.rel (!%p26_p2) target bundleno = 13 (0xd), region = 126 }
 0x551   :  { %1272 = vsyncpa [#allocation3], 1 }
 0x552   :  { %1274 = vsyncpa [#allocation3 + $0x1], 1 }
 0x553   :  { %1275 = vsyncpa [#allocation6], 1 }
 0x554   :  { %1277 = vsyncpa [#allocation6 + $0x1], 1 }
 0x555   :  { %1278 = vsyncpa [#allocation9], 1 }
 0x556   :  { %1279 = vsyncpa [#allocation4], 1 }
 0x557   :  { %1281 = vsyncpa [#allocation4 + $0x1], 1 }

</bundles_post_ra>
